<compile_context>
chip_gen: v5e
topology: v5e:2x2
jax: 0.10.0
libtpu: 0.0.40
codegen_flags: <defaults>
</compile_context>

<pallas_src>
import functools

import numpy as np
import jax
import jax.numpy as jnp
from jax.experimental import pallas as pl
from jax.experimental.pallas import tpu as pltpu

_BN_EPS = 1e-5
_F32 = jnp.float32
_BF16 = jnp.bfloat16


# ----------------------------- Pallas kernels -----------------------------

def _mm_kernel(x_ref, w_ref, b_ref, o_ref, *, relu):
    # y = x @ w + b  (optionally ReLU); bf16 operands, f32 accumulation.
    acc = jnp.dot(x_ref[...], w_ref[...], preferred_element_type=jnp.float32)
    y = acc + b_ref[...]
    if relu:
        y = jnp.maximum(y, 0.0)
    o_ref[...] = y.astype(o_ref.dtype)


def _mm_res_kernel(x_ref, w_ref, b_ref, r_ref, o_ref, *, relu):
    # y = x @ w + b + residual  (optionally ReLU) -- fused bottleneck epilogue.
    acc = jnp.dot(x_ref[...], w_ref[...], preferred_element_type=jnp.float32)
    y = acc + b_ref[...] + r_ref[...].astype(jnp.float32)
    if relu:
        y = jnp.maximum(y, 0.0)
    o_ref[...] = y.astype(o_ref.dtype)


def matmul_fused(x, w, b, residual=None, *, relu=False, tm=256, tn=256):
    """(M,K) @ (K,N) with fused bias / optional residual / optional ReLU.

    x, w, residual are bf16 (MXU-native); b is f32; output is bf16.
    """
    M, K = x.shape
    Kw, N = w.shape
    assert K == Kw
    tm = M if M < tm else tm       # full-dim block if small, else 256 (8-aligned)
    tn = N if N < tn else tn       # full-dim block if small, else 256 (128-aligned)
    grid = (pl.cdiv(M, tm), pl.cdiv(N, tn))
    b2 = b.reshape(1, N).astype(_F32)

    in_specs = [
        pl.BlockSpec((tm, K), lambda i, j: (i, 0)),
        pl.BlockSpec((K, tn), lambda i, j: (0, j)),
        pl.BlockSpec((1, tn), lambda i, j: (0, j)),
    ]
    args = [x, w, b2]
    if residual is not None:
        in_specs.append(pl.BlockSpec((tm, tn), lambda i, j: (i, j)))
        args.append(residual)
        kernel = functools.partial(_mm_res_kernel, relu=relu)
    else:
        kernel = functools.partial(_mm_kernel, relu=relu)

    return pl.pallas_call(
        kernel,
        out_shape=jax.ShapeDtypeStruct((M, N), _BF16),
        grid=grid,
        in_specs=in_specs,
        out_specs=pl.BlockSpec((tm, tn), lambda i, j: (i, j)),
        compiler_params=pltpu.CompilerParams(
            dimension_semantics=("parallel", "parallel")),
    )(*args)


def _conv3x3_kernel(x_ref, w_ref, b_ref, o_ref, *, dilation, wo, relu):
    """One output row of a 3x3 dilated conv (stride 1, padding == dilation).

    x_ref: (Hp, Wp, Cin) padded image of the current batch element (resident
           in VMEM across all output rows of that element).
    w_ref: (3, 3, Cin, Cout); b_ref: (1, Cout); o_ref: (Wo, Cout).
    """
    h = pl.program_id(1)
    cout = w_ref.shape[-1]
    acc = jnp.zeros((wo, cout), jnp.float32)
    for kh in range(3):
        band = x_ref[h + kh * dilation]                       # (Wp, Cin)
        for kw in range(3):
            tap = band[kw * dilation:kw * dilation + wo, :]   # (Wo, Cin)
            acc = acc + jnp.dot(tap, w_ref[kh, kw],
                                preferred_element_type=jnp.float32)
    y = acc + b_ref[...]
    if relu:
        y = jnp.maximum(y, 0.0)
    o_ref[...] = y.astype(o_ref.dtype)


def conv3x3_dilated(x, w, b, *, dilation=1, relu=False):
    """x:(N,H,W,Cin) bf16, w:(3,3,Cin,Cout) bf16 -> (N,H,W,Cout) bf16."""
    N, H, W, Cin = x.shape
    KH, KW, _, Cout = w.shape
    d = dilation
    xp = jnp.pad(x, ((0, 0), (d, d), (d, d), (0, 0)))
    Hp, Wp = H + 2 * d, W + 2 * d
    Ho, Wo = H, W                      # stride 1, padding == dilation
    b2 = b.reshape(1, Cout).astype(_F32)

    return pl.pallas_call(
        functools.partial(_conv3x3_kernel, dilation=d, wo=Wo, relu=relu),
        out_shape=jax.ShapeDtypeStruct((N, Ho, Wo, Cout), _BF16),
        grid=(N, Ho),
        in_specs=[
            # Padded image: block changes only with the batch index -> the
            # image is DMA'd once per batch element and reused for every row.
            pl.BlockSpec((None, Hp, Wp, Cin), lambda n, h: (n, 0, 0, 0)),
            pl.BlockSpec((KH, KW, Cin, Cout), lambda n, h: (0, 0, 0, 0)),
            pl.BlockSpec((1, Cout), lambda n, h: (0, 0)),
        ],
        out_specs=pl.BlockSpec((None, None, Wo, Cout), lambda n, h: (n, h, 0, 0)),
        compiler_params=pltpu.CompilerParams(
            dimension_semantics=("parallel", "arbitrary")),
    )(xp, w, b2)


# ----------------------------- parameters -----------------------------

def _fold_bn(w, gamma, beta, mean, var):
    """Fold inference-mode BatchNorm into the preceding conv (bias-free)."""
    scale = gamma / jnp.sqrt(var + _BN_EPS)            # per out-channel
    w_folded = (w * scale).astype(_BF16)               # broadcast over last axis
    b_folded = (beta - mean * scale).astype(_F32).reshape(1, -1)
    return w_folded, b_folded


def init_bottleneck_params(key, inplanes, planes, stride=1, dilation=1,
                           with_downsample=None):
    expansion = 4
    if with_downsample is None:
        with_downsample = (stride != 1) or (inplanes != planes * expansion)
    ks = jax.random.split(key, 4)

    def conv_w(k, kh, kw, cin, cout):
        bound = 1.0 / np.sqrt(kh * kw * cin)
        return jax.random.uniform(k, (kh, kw, cin, cout), _F32, -bound, bound)

    def bn(c):
        # gamma, beta, running_mean, running_var (fresh init, frozen)
        return (jnp.ones((c,), _F32), jnp.zeros((c,), _F32),
                jnp.zeros((c,), _F32), jnp.ones((c,), _F32))

    p = {}
    p['w1'], p['b1'] = _fold_bn(conv_w(ks[0], 1, 1, inplanes, planes), *bn(planes))
    p['w2'], p['b2'] = _fold_bn(conv_w(ks[1], 3, 3, planes, planes), *bn(planes))
    p['w3'], p['b3'] = _fold_bn(conv_w(ks[2], 1, 1, planes, planes * expansion),
                                *bn(planes * expansion))
    if with_downsample:
        p['wd'], p['bd'] = _fold_bn(conv_w(ks[3], 1, 1, inplanes, planes * expansion),
                                    *bn(planes * expansion))
    return p


# ----------------------------- forward -----------------------------

@functools.partial(jax.jit, static_argnames=("stride", "dilation"))
def bottleneck_forward(params, x_nchw, *, stride=1, dilation=1):
    """Input NCHW f32; returns NCHW f32 (channels = planes * 4)."""
    x = jnp.transpose(x_nchw, (0, 2, 3, 1)).astype(_BF16)     # -> NHWC bf16
    N, H, W, Cin = x.shape

    # conv1 / downsample are 1x1 convs with this stride -> spatial subsample.
    xs = x[:, ::stride, ::stride, :] if stride > 1 else x
    Ho, Wo = xs.shape[1], xs.shape[2]
    M = N * Ho * Wo
    x2d = xs.reshape(M, Cin)

    planes = params['w1'].shape[-1]
    cout = params['w3'].shape[-1]

    # conv1 (1x1, stride) + bn1 + relu
    y = matmul_fused(x2d, params['w1'].reshape(Cin, planes), params['b1'],
                     relu=True)

    # conv2 (3x3, dilated, stride 1, padding=dilation) + bn2 + relu
    y = conv3x3_dilated(y.reshape(N, Ho, Wo, planes), params['w2'],
                        params['b2'], dilation=dilation, relu=True)

    # residual branch
    if 'wd' in params:
        residual = matmul_fused(x2d, params['wd'].reshape(Cin, cout),
                                params['bd'], relu=False)
    else:
        residual = x2d                                        # identity shortcut

    # conv3 (1x1) + bn3 + residual add + relu  (all fused in one kernel)
    out = matmul_fused(y.reshape(M, planes), params['w3'].reshape(planes, cout),
                       params['b3'], residual=residual, relu=True)

    out = out.reshape(N, Ho, Wo, cout)
    return jnp.transpose(out, (0, 3, 1, 2)).astype(_F32)      # -> NCHW f32


# ----------------------------- main -----------------------------

if __name__ == "__main__":
    key = jax.random.PRNGKey(0)
    pkey, xkey = jax.random.split(key)

    inplanes, planes, stride, dilation = 32, 16, 1, 2
    batch, H, W = 2, 16, 16

    params = init_bottleneck_params(pkey, inplanes, planes, stride, dilation)
    x = jax.random.normal(xkey, (batch, inplanes, H, W), dtype=_F32)   # NCHW

    out = bottleneck_forward(params, x, stride=stride, dilation=dilation)
    jax.block_until_ready(out)

    assert out.shape == (batch, planes * 4, H // stride, W // stride), out.shape
    assert bool(jnp.all(jnp.isfinite(out)))
    print("KERNEL_OK")
</pallas_src>

<mosaic_0001>
module attributes {stable_mosaic.version = 11 : i64} {
  func.func @_mm_kernel(%arg0: i32, %arg1: i32, %arg2: memref<256x32xbf16, #tpu.memory_space<vmem>>, %arg3: memref<32x16xbf16, #tpu.memory_space<vmem>>, %arg4: memref<1x16xf32, #tpu.memory_space<vmem>>, %arg5: memref<256x16xbf16, #tpu.memory_space<vmem>>) attributes {dimension_semantics = [#tpu.dimension_semantics<parallel>, #tpu.dimension_semantics<parallel>], iteration_bounds = array<i64: 2, 1>, scalar_prefetch = 0 : i64, scratch_operands = 0 : i64, tpu.core_type = #tpu.core_type<tc>, window_params = [{transform_indices = @transform_0, window_bounds = array<i64: 256, 32>}, {transform_indices = @transform_1, window_bounds = array<i64: 32, 16>}, {transform_indices = @transform_2, window_bounds = array<i64: 1, 16>}, {transform_indices = @transform_3, window_bounds = array<i64: 256, 16>}]} {
    %c0 = arith.constant 0 : index
    %c0_0 = arith.constant 0 : index
    %0 = vector.load %arg2[%c0, %c0_0] : memref<256x32xbf16, #tpu.memory_space<vmem>>, vector<256x32xbf16>
    %c0_1 = arith.constant 0 : index
    %c0_2 = arith.constant 0 : index
    %1 = vector.load %arg3[%c0_1, %c0_2] : memref<32x16xbf16, #tpu.memory_space<vmem>>, vector<32x16xbf16>
    %cst = arith.constant dense<0.000000e+00> : vector<256x16xf32>
    %2 = tpu.matmul %0, %1, %cst {dimension_numbers = #tpu.dot_dimension_numbers<[1], [0], [0], [1], [0, 0, 1, 1], [], []>} : vector<256x32xbf16>, vector<32x16xbf16>, vector<256x16xf32> -> vector<256x16xf32>
    %c0_3 = arith.constant 0 : index
    %c0_4 = arith.constant 0 : index
    %3 = vector.load %arg4[%c0_3, %c0_4] : memref<1x16xf32, #tpu.memory_space<vmem>>, vector<1x16xf32>
    %4 = vector.broadcast %3 : vector<1x16xf32> to vector<256x16xf32>
    %5 = arith.addf %2, %4 : vector<256x16xf32>
    %cst_5 = arith.constant 0.000000e+00 : f32
    %6 = vector.broadcast %cst_5 : f32 to vector<256x16xf32>
    %7 = arith.maximumf %5, %6 : vector<256x16xf32>
    %8 = arith.truncf %7 : vector<256x16xf32> to vector<256x16xbf16>
    %c0_6 = arith.constant 0 : index
    %c0_7 = arith.constant 0 : index
    %9 = vector.load %arg5[%c0_6, %c0_7] : memref<256x16xbf16, #tpu.memory_space<vmem>>, vector<256x16xbf16>
    tpu.vector_store %arg5[%c0_6, %c0_7], %8 {strides = array<i32>} : memref<256x16xbf16, #tpu.memory_space<vmem>>, vector<256x16xbf16>,
    return
  }
  func.func @transform_0(%arg0: i32, %arg1: i32) -> (i32, i32) {
    %c0_i32 = arith.constant 0 : i32
    %c0_i32_0 = arith.constant 0 : i32
    return %arg0, %c0_i32 : i32, i32
  }
  func.func @transform_1(%arg0: i32, %arg1: i32) -> (i32, i32) {
    %c0_i32 = arith.constant 0 : i32
    %c0_i32_0 = arith.constant 0 : i32
    return %c0_i32, %arg1 : i32, i32
  }
  func.func @transform_2(%arg0: i32, %arg1: i32) -> (i32, i32) {
    %c0_i32 = arith.constant 0 : i32
    %c0_i32_0 = arith.constant 0 : i32
    return %c0_i32, %arg1 : i32, i32
  }
  func.func @transform_3(%arg0: i32, %arg1: i32) -> (i32, i32) {
    %c0_i32 = arith.constant 0 : i32
    return %arg0, %arg1 : i32, i32
  }
}

module attributes {stable_mosaic.version = 11 : i64} {
  func.func @_mm_kernel(%arg0: i32, %arg1: i32, %arg2: memref<256x32xbf16, #tpu.memory_space<vmem>>, %arg3: memref<32x64xbf16, #tpu.memory_space<vmem>>, %arg4: memref<1x64xf32, #tpu.memory_space<vmem>>, %arg5: memref<256x64xbf16, #tpu.memory_space<vmem>>) attributes {dimension_semantics = [#tpu.dimension_semantics<parallel>, #tpu.dimension_semantics<parallel>], iteration_bounds = array<i64: 2, 1>, scalar_prefetch = 0 : i64, scratch_operands = 0 : i64, tpu.core_type = #tpu.core_type<tc>, window_params = [{transform_indices = @transform_0, window_bounds = array<i64: 256, 32>}, {transform_indices = @transform_1, window_bounds = array<i64: 32, 64>}, {transform_indices = @transform_2, window_bounds = array<i64: 1, 64>}, {transform_indices = @transform_3, window_bounds = array<i64: 256, 64>}]} {
    %c0 = arith.constant 0 : index
    %c0_0 = arith.constant 0 : index
    %0 = vector.load %arg2[%c0, %c0_0] : memref<256x32xbf16, #tpu.memory_space<vmem>>, vector<256x32xbf16>
    %c0_1 = arith.constant 0 : index
    %c0_2 = arith.constant 0 : index
    %1 = vector.load %arg3[%c0_1, %c0_2] : memref<32x64xbf16, #tpu.memory_space<vmem>>, vector<32x64xbf16>
    %cst = arith.constant dense<0.000000e+00> : vector<256x64xf32>
    %2 = tpu.matmul %0, %1, %cst {dimension_numbers = #tpu.dot_dimension_numbers<[1], [0], [0], [1], [0, 0, 1, 1], [], []>} : vector<256x32xbf16>, vector<32x64xbf16>, vector<256x64xf32> -> vector<256x64xf32>
    %c0_3 = arith.constant 0 : index
    %c0_4 = arith.constant 0 : index
    %3 = vector.load %arg4[%c0_3, %c0_4] : memref<1x64xf32, #tpu.memory_space<vmem>>, vector<1x64xf32>
    %4 = vector.broadcast %3 : vector<1x64xf32> to vector<256x64xf32>
    %5 = arith.addf %2, %4 : vector<256x64xf32>
    %6 = arith.truncf %5 : vector<256x64xf32> to vector<256x64xbf16>
    %c0_5 = arith.constant 0 : index
    %c0_6 = arith.constant 0 : index
    %7 = vector.load %arg5[%c0_5, %c0_6] : memref<256x64xbf16, #tpu.memory_space<vmem>>, vector<256x64xbf16>
    tpu.vector_store %arg5[%c0_5, %c0_6], %6 {strides = array<i32>} : memref<256x64xbf16, #tpu.memory_space<vmem>>, vector<256x64xbf16>,
    return
  }
  func.func @transform_0(%arg0: i32, %arg1: i32) -> (i32, i32) {
    %c0_i32 = arith.constant 0 : i32
    %c0_i32_0 = arith.constant 0 : i32
    return %arg0, %c0_i32 : i32, i32
  }
  func.func @transform_1(%arg0: i32, %arg1: i32) -> (i32, i32) {
    %c0_i32 = arith.constant 0 : i32
    %c0_i32_0 = arith.constant 0 : i32
    return %c0_i32, %arg1 : i32, i32
  }
  func.func @transform_2(%arg0: i32, %arg1: i32) -> (i32, i32) {
    %c0_i32 = arith.constant 0 : i32
    %c0_i32_0 = arith.constant 0 : i32
    return %c0_i32, %arg1 : i32, i32
  }
  func.func @transform_3(%arg0: i32, %arg1: i32) -> (i32, i32) {
    %c0_i32 = arith.constant 0 : i32
    return %arg0, %arg1 : i32, i32
  }
}

module attributes {stable_mosaic.version = 11 : i64} {
  func.func @_conv3x3_kernel(%arg0: i32, %arg1: i32, %arg2: memref<1x20x20x16xbf16, #tpu.memory_space<vmem>>, %arg3: memref<3x3x16x16xbf16, #tpu.memory_space<vmem>>, %arg4: memref<1x16xf32, #tpu.memory_space<vmem>>, %arg5: memref<1x1x16x16xbf16, #tpu.memory_space<vmem>>) attributes {dimension_semantics = [#tpu.dimension_semantics<parallel>, #tpu.dimension_semantics<arbitrary>], iteration_bounds = array<i64: 2, 16>, scalar_prefetch = 0 : i64, scratch_operands = 0 : i64, tpu.core_type = #tpu.core_type<tc>, window_params = [{transform_indices = @transform_0, window_bounds = array<i64: 1, 20, 20, 16>}, {pipeline_mode = #tpu.pipeline_mode<synchronous>, transform_indices = @transform_1, window_bounds = array<i64: 3, 3, 16, 16>}, {pipeline_mode = #tpu.pipeline_mode<synchronous>, transform_indices = @transform_2, window_bounds = array<i64: 1, 16>}, {transform_indices = @transform_3, window_bounds = array<i64: 1, 1, 16, 16>}]} {
    %cst = arith.constant 0.000000e+00 : f32
    %0 = vector.broadcast %cst : f32 to vector<16x16xf32>
    %c0_i32 = arith.constant 0 : i32
    %1 = arith.addi %arg1, %c0_i32 : i32
    %c0 = arith.constant 0 : index
    %2 = arith.index_cast %1 : i32 to index
    %c0_0 = arith.constant 0 : index
    %c0_1 = arith.constant 0 : index
    %3 = vector.load %arg2[%c0, %2, %c0_0, %c0_1] : memref<1x20x20x16xbf16, #tpu.memory_space<vmem>>, vector<1x1x20x16xbf16>
    %4 = vector.shape_cast %3 : vector<1x1x20x16xbf16> to vector<20x16xbf16>
    %5 = vector.extract_strided_slice %4 {offsets = [0, 0], sizes = [16, 16], strides = [1, 1]} : vector<20x16xbf16> to vector<16x16xbf16>
    %c0_2 = arith.constant 0 : index
    %c0_3 = arith.constant 0 : index
    %c0_4 = arith.constant 0 : index
    %c0_5 = arith.constant 0 : index
    %6 = vector.load %arg3[%c0_2, %c0_3, %c0_4, %c0_5] : memref<3x3x16x16xbf16, #tpu.memory_space<vmem>>, vector<1x1x16x16xbf16>
    %7 = vector.shape_cast %6 : vector<1x1x16x16xbf16> to vector<16x16xbf16>
    %cst_6 = arith.constant dense<0.000000e+00> : vector<16x16xf32>
    %8 = tpu.matmul %5, %7, %cst_6 {dimension_numbers = #tpu.dot_dimension_numbers<[1], [0], [0], [1], [0, 0, 1, 1], [], []>} : vector<16x16xbf16>, vector<16x16xbf16>, vector<16x16xf32> -> vector<16x16xf32>
    %9 = arith.addf %0, %8 : vector<16x16xf32>
    %10 = vector.extract_strided_slice %4 {offsets = [2, 0], sizes = [16, 16], strides = [1, 1]} : vector<20x16xbf16> to vector<16x16xbf16>
    %c0_7 = arith.constant 0 : index
    %c1 = arith.constant 1 : index
    %c0_8 = arith.constant 0 : index
    %c0_9 = arith.constant 0 : index
    %11 = vector.load %arg3[%c0_7, %c1, %c0_8, %c0_9] : memref<3x3x16x16xbf16, #tpu.memory_space<vmem>>, vector<1x1x16x16xbf16>
    %12 = vector.shape_cast %11 : vector<1x1x16x16xbf16> to vector<16x16xbf16>
    %cst_10 = arith.constant dense<0.000000e+00> : vector<16x16xf32>
    %13 = tpu.matmul %10, %12, %cst_10 {dimension_numbers = #tpu.dot_dimension_numbers<[1], [0], [0], [1], [0, 0, 1, 1], [], []>} : vector<16x16xbf16>, vector<16x16xbf16>, vector<16x16xf32> -> vector<16x16xf32>
    %14 = arith.addf %9, %13 : vector<16x16xf32>
    %15 = vector.extract_strided_slice %4 {offsets = [4, 0], sizes = [16, 16], strides = [1, 1]} : vector<20x16xbf16> to vector<16x16xbf16>
    %c0_11 = arith.constant 0 : index
    %c2 = arith.constant 2 : index
    %c0_12 = arith.constant 0 : index
    %c0_13 = arith.constant 0 : index
    %16 = vector.load %arg3[%c0_11, %c2, %c0_12, %c0_13] : memref<3x3x16x16xbf16, #tpu.memory_space<vmem>>, vector<1x1x16x16xbf16>
    %17 = vector.shape_cast %16 : vector<1x1x16x16xbf16> to vector<16x16xbf16>
    %cst_14 = arith.constant dense<0.000000e+00> : vector<16x16xf32>
    %18 = tpu.matmul %15, %17, %cst_14 {dimension_numbers = #tpu.dot_dimension_numbers<[1], [0], [0], [1], [0, 0, 1, 1], [], []>} : vector<16x16xbf16>, vector<16x16xbf16>, vector<16x16xf32> -> vector<16x16xf32>
    %19 = arith.addf %14, %18 : vector<16x16xf32>
    %c2_i32 = arith.constant 2 : i32
    %20 = arith.addi %arg1, %c2_i32 : i32
    %c0_15 = arith.constant 0 : index
    %21 = arith.index_cast %20 : i32 to index
    %c0_16 = arith.constant 0 : index
    %c0_17 = arith.constant 0 : index
    %22 = vector.load %arg2[%c0_15, %21, %c0_16, %c0_17] : memref<1x20x20x16xbf16, #tpu.memory_space<vmem>>, vector<1x1x20x16xbf16>
    %23 = vector.shape_cast %22 : vector<1x1x20x16xbf16> to vector<20x16xbf16>
    %24 = vector.extract_strided_slice %23 {offsets = [0, 0], sizes = [16, 16], strides = [1, 1]} : vector<20x16xbf16> to vector<16x16xbf16>
    %c1_18 = arith.constant 1 : index
    %c0_19 = arith.constant 0 : index
    %c0_20 = arith.constant 0 : index
    %c0_21 = arith.constant 0 : index
    %25 = vector.load %arg3[%c1_18, %c0_19, %c0_20, %c0_21] : memref<3x3x16x16xbf16, #tpu.memory_space<vmem>>, vector<1x1x16x16xbf16>
    %26 = vector.shape_cast %25 : vector<1x1x16x16xbf16> to vector<16x16xbf16>
    %cst_22 = arith.constant dense<0.000000e+00> : vector<16x16xf32>
    %27 = tpu.matmul %24, %26, %cst_22 {dimension_numbers = #tpu.dot_dimension_numbers<[1], [0], [0], [1], [0, 0, 1, 1], [], []>} : vector<16x16xbf16>, vector<16x16xbf16>, vector<16x16xf32> -> vector<16x16xf32>
    %28 = arith.addf %19, %27 : vector<16x16xf32>
    %29 = vector.extract_strided_slice %23 {offsets = [2, 0], sizes = [16, 16], strides = [1, 1]} : vector<20x16xbf16> to vector<16x16xbf16>
    %c1_23 = arith.constant 1 : index
    %c1_24 = arith.constant 1 : index
    %c0_25 = arith.constant 0 : index
    %c0_26 = arith.constant 0 : index
    %30 = vector.load %arg3[%c1_23, %c1_24, %c0_25, %c0_26] : memref<3x3x16x16xbf16, #tpu.memory_space<vmem>>, vector<1x1x16x16xbf16>
    %31 = vector.shape_cast %30 : vector<1x1x16x16xbf16> to vector<16x16xbf16>
    %cst_27 = arith.constant dense<0.000000e+00> : vector<16x16xf32>
    %32 = tpu.matmul %29, %31, %cst_27 {dimension_numbers = #tpu.dot_dimension_numbers<[1], [0], [0], [1], [0, 0, 1, 1], [], []>} : vector<16x16xbf16>, vector<16x16xbf16>, vector<16x16xf32> -> vector<16x16xf32>
    %33 = arith.addf %28, %32 : vector<16x16xf32>
    %34 = vector.extract_strided_slice %23 {offsets = [4, 0], sizes = [16, 16], strides = [1, 1]} : vector<20x16xbf16> to vector<16x16xbf16>
    %c1_28 = arith.constant 1 : index
    %c2_29 = arith.constant 2 : index
    %c0_30 = arith.constant 0 : index
    %c0_31 = arith.constant 0 : index
    %35 = vector.load %arg3[%c1_28, %c2_29, %c0_30, %c0_31] : memref<3x3x16x16xbf16, #tpu.memory_space<vmem>>, vector<1x1x16x16xbf16>
    %36 = vector.shape_cast %35 : vector<1x1x16x16xbf16> to vector<16x16xbf16>
    %cst_32 = arith.constant dense<0.000000e+00> : vector<16x16xf32>
    %37 = tpu.matmul %34, %36, %cst_32 {dimension_numbers = #tpu.dot_dimension_numbers<[1], [0], [0], [1], [0, 0, 1, 1], [], []>} : vector<16x16xbf16>, vector<16x16xbf16>, vector<16x16xf32> -> vector<16x16xf32>
    %38 = arith.addf %33, %37 : vector<16x16xf32>
    %c4_i32 = arith.constant 4 : i32
    %39 = arith.addi %arg1, %c4_i32 : i32
    %c0_33 = arith.constant 0 : index
    %40 = arith.index_cast %39 : i32 to index
    %c0_34 = arith.constant 0 : index
    %c0_35 = arith.constant 0 : index
    %41 = vector.load %arg2[%c0_33, %40, %c0_34, %c0_35] : memref<1x20x20x16xbf16, #tpu.memory_space<vmem>>, vector<1x1x20x16xbf16>
    %42 = vector.shape_cast %41 : vector<1x1x20x16xbf16> to vector<20x16xbf16>
    %43 = vector.extract_strided_slice %42 {offsets = [0, 0], sizes = [16, 16], strides = [1, 1]} : vector<20x16xbf16> to vector<16x16xbf16>
    %c2_36 = arith.constant 2 : index
    %c0_37 = arith.constant 0 : index
    %c0_38 = arith.constant 0 : index
    %c0_39 = arith.constant 0 : index
    %44 = vector.load %arg3[%c2_36, %c0_37, %c0_38, %c0_39] : memref<3x3x16x16xbf16, #tpu.memory_space<vmem>>, vector<1x1x16x16xbf16>
    %45 = vector.shape_cast %44 : vector<1x1x16x16xbf16> to vector<16x16xbf16>
    %cst_40 = arith.constant dense<0.000000e+00> : vector<16x16xf32>
    %46 = tpu.matmul %43, %45, %cst_40 {dimension_numbers = #tpu.dot_dimension_numbers<[1], [0], [0], [1], [0, 0, 1, 1], [], []>} : vector<16x16xbf16>, vector<16x16xbf16>, vector<16x16xf32> -> vector<16x16xf32>
    %47 = arith.addf %38, %46 : vector<16x16xf32>
    %48 = vector.extract_strided_slice %42 {offsets = [2, 0], sizes = [16, 16], strides = [1, 1]} : vector<20x16xbf16> to vector<16x16xbf16>
    %c2_41 = arith.constant 2 : index
    %c1_42 = arith.constant 1 : index
    %c0_43 = arith.constant 0 : index
    %c0_44 = arith.constant 0 : index
    %49 = vector.load %arg3[%c2_41, %c1_42, %c0_43, %c0_44] : memref<3x3x16x16xbf16, #tpu.memory_space<vmem>>, vector<1x1x16x16xbf16>
    %50 = vector.shape_cast %49 : vector<1x1x16x16xbf16> to vector<16x16xbf16>
    %cst_45 = arith.constant dense<0.000000e+00> : vector<16x16xf32>
    %51 = tpu.matmul %48, %50, %cst_45 {dimension_numbers = #tpu.dot_dimension_numbers<[1], [0], [0], [1], [0, 0, 1, 1], [], []>} : vector<16x16xbf16>, vector<16x16xbf16>, vector<16x16xf32> -> vector<16x16xf32>
    %52 = arith.addf %47, %51 : vector<16x16xf32>
    %53 = vector.extract_strided_slice %42 {offsets = [4, 0], sizes = [16, 16], strides = [1, 1]} : vector<20x16xbf16> to vector<16x16xbf16>
    %c2_46 = arith.constant 2 : index
    %c2_47 = arith.constant 2 : index
    %c0_48 = arith.constant 0 : index
    %c0_49 = arith.constant 0 : index
    %54 = vector.load %arg3[%c2_46, %c2_47, %c0_48, %c0_49] : memref<3x3x16x16xbf16, #tpu.memory_space<vmem>>, vector<1x1x16x16xbf16>
    %55 = vector.shape_cast %54 : vector<1x1x16x16xbf16> to vector<16x16xbf16>
    %cst_50 = arith.constant dense<0.000000e+00> : vector<16x16xf32>
    %56 = tpu.matmul %53, %55, %cst_50 {dimension_numbers = #tpu.dot_dimension_numbers<[1], [0], [0], [1], [0, 0, 1, 1], [], []>} : vector<16x16xbf16>, vector<16x16xbf16>, vector<16x16xf32> -> vector<16x16xf32>
    %57 = arith.addf %52, %56 : vector<16x16xf32>
    %c0_51 = arith.constant 0 : index
    %c0_52 = arith.constant 0 : index
    %58 = vector.load %arg4[%c0_51, %c0_52] : memref<1x16xf32, #tpu.memory_space<vmem>>, vector<1x16xf32>
    %59 = vector.broadcast %58 : vector<1x16xf32> to vector<16x16xf32>
    %60 = arith.addf %57, %59 : vector<16x16xf32>
    %cst_53 = arith.constant 0.000000e+00 : f32
    %61 = vector.broadcast %cst_53 : f32 to vector<16x16xf32>
    %62 = arith.maximumf %60, %61 : vector<16x16xf32>
    %63 = arith.truncf %62 : vector<16x16xf32> to vector<16x16xbf16>
    %c0_54 = arith.constant 0 : index
    %c0_55 = arith.constant 0 : index
    %c0_56 = arith.constant 0 : index
    %c0_57 = arith.constant 0 : index
    %64 = vector.load %arg5[%c0_54, %c0_55, %c0_56, %c0_57] : memref<1x1x16x16xbf16, #tpu.memory_space<vmem>>, vector<1x1x16x16xbf16>
    %65 = vector.shape_cast %64 : vector<1x1x16x16xbf16> to vector<16x16xbf16>
    %66 = vector.shape_cast %63 : vector<16x16xbf16> to vector<1x1x16x16xbf16>
    tpu.vector_store %arg5[%c0_54, %c0_55, %c0_56, %c0_57], %66 {strides = array<i32>} : memref<1x1x16x16xbf16, #tpu.memory_space<vmem>>, vector<1x1x16x16xbf16>,
    return
  }
  func.func @transform_0(%arg0: i32, %arg1: i32) -> (i32, i32, i32, i32) {
    %c0_i32 = arith.constant 0 : i32
    %c0_i32_0 = arith.constant 0 : i32
    %c0_i32_1 = arith.constant 0 : i32
    %c0_i32_2 = arith.constant 0 : i32
    return %arg0, %c0_i32, %c0_i32_0, %c0_i32_1 : i32, i32, i32, i32
  }
  func.func @transform_1(%arg0: i32, %arg1: i32) -> (i32, i32, i32, i32) {
    %c0_i32 = arith.constant 0 : i32
    %c0_i32_0 = arith.constant 0 : i32
    %c0_i32_1 = arith.constant 0 : i32
    %c0_i32_2 = arith.constant 0 : i32
    %c0_i32_3 = arith.constant 0 : i32
    return %c0_i32, %c0_i32_0, %c0_i32_1, %c0_i32_2 : i32, i32, i32, i32
  }
  func.func @transform_2(%arg0: i32, %arg1: i32) -> (i32, i32) {
    %c0_i32 = arith.constant 0 : i32
    %c0_i32_0 = arith.constant 0 : i32
    %c0_i32_1 = arith.constant 0 : i32
    return %c0_i32, %c0_i32_0 : i32, i32
  }
  func.func @transform_3(%arg0: i32, %arg1: i32) -> (i32, i32, i32, i32) {
    %c0_i32 = arith.constant 0 : i32
    %c0_i32_0 = arith.constant 0 : i32
    %c0_i32_1 = arith.constant 0 : i32
    return %arg0, %arg1, %c0_i32, %c0_i32_0 : i32, i32, i32, i32
  }
}

module attributes {stable_mosaic.version = 11 : i64} {
  func.func @_mm_res_kernel(%arg0: i32, %arg1: i32, %arg2: memref<256x16xbf16, #tpu.memory_space<vmem>>, %arg3: memref<16x64xbf16, #tpu.memory_space<vmem>>, %arg4: memref<1x64xf32, #tpu.memory_space<vmem>>, %arg5: memref<256x64xbf16, #tpu.memory_space<vmem>>, %arg6: memref<256x64xbf16, #tpu.memory_space<vmem>>) attributes {dimension_semantics = [#tpu.dimension_semantics<parallel>, #tpu.dimension_semantics<parallel>], iteration_bounds = array<i64: 2, 1>, scalar_prefetch = 0 : i64, scratch_operands = 0 : i64, tpu.core_type = #tpu.core_type<tc>, window_params = [{transform_indices = @transform_0, window_bounds = array<i64: 256, 16>}, {transform_indices = @transform_1, window_bounds = array<i64: 16, 64>}, {transform_indices = @transform_2, window_bounds = array<i64: 1, 64>}, {transform_indices = @transform_3, window_bounds = array<i64: 256, 64>}, {transform_indices = @transform_4, window_bounds = array<i64: 256, 64>}]} {
    %c0 = arith.constant 0 : index
    %c0_0 = arith.constant 0 : index
    %0 = vector.load %arg2[%c0, %c0_0] : memref<256x16xbf16, #tpu.memory_space<vmem>>, vector<256x16xbf16>
    %c0_1 = arith.constant 0 : index
    %c0_2 = arith.constant 0 : index
    %1 = vector.load %arg3[%c0_1, %c0_2] : memref<16x64xbf16, #tpu.memory_space<vmem>>, vector<16x64xbf16>
    %cst = arith.constant dense<0.000000e+00> : vector<256x64xf32>
    %2 = tpu.matmul %0, %1, %cst {dimension_numbers = #tpu.dot_dimension_numbers<[1], [0], [0], [1], [0, 0, 1, 1], [], []>} : vector<256x16xbf16>, vector<16x64xbf16>, vector<256x64xf32> -> vector<256x64xf32>
    %c0_3 = arith.constant 0 : index
    %c0_4 = arith.constant 0 : index
    %3 = vector.load %arg4[%c0_3, %c0_4] : memref<1x64xf32, #tpu.memory_space<vmem>>, vector<1x64xf32>
    %4 = vector.broadcast %3 : vector<1x64xf32> to vector<256x64xf32>
    %5 = arith.addf %2, %4 : vector<256x64xf32>
    %c0_5 = arith.constant 0 : index
    %c0_6 = arith.constant 0 : index
    %6 = vector.load %arg5[%c0_5, %c0_6] : memref<256x64xbf16, #tpu.memory_space<vmem>>, vector<256x64xbf16>
    %7 = arith.extf %6 : vector<256x64xbf16> to vector<256x64xf32>
    %8 = arith.addf %5, %7 : vector<256x64xf32>
    %cst_7 = arith.constant 0.000000e+00 : f32
    %9 = vector.broadcast %cst_7 : f32 to vector<256x64xf32>
    %10 = arith.maximumf %8, %9 : vector<256x64xf32>
    %11 = arith.truncf %10 : vector<256x64xf32> to vector<256x64xbf16>
    %c0_8 = arith.constant 0 : index
    %c0_9 = arith.constant 0 : index
    %12 = vector.load %arg6[%c0_8, %c0_9] : memref<256x64xbf16, #tpu.memory_space<vmem>>, vector<256x64xbf16>
    tpu.vector_store %arg6[%c0_8, %c0_9], %11 {strides = array<i32>} : memref<256x64xbf16, #tpu.memory_space<vmem>>, vector<256x64xbf16>,
    return
  }
  func.func @transform_0(%arg0: i32, %arg1: i32) -> (i32, i32) {
    %c0_i32 = arith.constant 0 : i32
    %c0_i32_0 = arith.constant 0 : i32
    return %arg0, %c0_i32 : i32, i32
  }
  func.func @transform_1(%arg0: i32, %arg1: i32) -> (i32, i32) {
    %c0_i32 = arith.constant 0 : i32
    %c0_i32_0 = arith.constant 0 : i32
    return %c0_i32, %arg1 : i32, i32
  }
  func.func @transform_2(%arg0: i32, %arg1: i32) -> (i32, i32) {
    %c0_i32 = arith.constant 0 : i32
    %c0_i32_0 = arith.constant 0 : i32
    return %c0_i32, %arg1 : i32, i32
  }
  func.func @transform_3(%arg0: i32, %arg1: i32) -> (i32, i32) {
    %c0_i32 = arith.constant 0 : i32
    return %arg0, %arg1 : i32, i32
  }
  func.func @transform_4(%arg0: i32, %arg1: i32) -> (i32, i32) {
    %c0_i32 = arith.constant 0 : i32
    return %arg0, %arg1 : i32, i32
  }
}

</mosaic_0001>

<bundles_post_ra>
// kernel: bottleneck_forward.4
= control target key start
LH: loop header
LB: loop body
LE: loop exit
PB: predicated region body
PF: predicated region fallthrough
CT: control target
= control target key end

     0   :  { %s889_s12 = smov 0   ;;  %s891_s13 = smov 0   ;;  %s1072_s0 = inlined_call_operand.vmem [shape: bf16[512,32], index: 0, kind: input, shape index: {}]   ;;  %s1073_s1 = inlined_call_operand.vmem [shape: bf16[32,16], index: 1, kind: input, shape index: {}]   ;;  %s1074_s2 = inlined_call_operand.vmem [shape: f32[1,16], index: 2, kind: input, shape index: {}]   ;;  %s1075_s3 = inlined_call_operand.vmem [shape: bf16[512,16], index: 3, kind: output, shape index: {}]  }
   0x1   :  { %s893_s14 = smov 0  }
   0x2 LB: > { %s25_s15 = sadd.s32 1, %s863_s13  ;;  %p701_p0 = scmp.ge.s32.totalorder %s867_s14, 1  ;;  %s867_s14 = sphi %s893_s14, %s13_s14   ;;  %s863_s13 = sphi %s891_s13, %s1077_s13   ;;  %s859_s12 = sphi %s889_s12, %s1076_s12  }
   0x3   : > { %p27_p1 = scmp.ge.s32.totalorder %s25_s15, 2  ;;  %p169_p2 = scmp.lt.s32.totalorder %s867_s14, 3 }
   0x5   : > { %s1079_s15 = smov (%p27_p1, %s25_s15), 0  ;;  %p170_p3 = pnand %p701_p0, %p169_p2 }
   0x6   : > { %s702_s18 = sshll.u32 (!%p170_p3), %s859_s12, 5 }
   0x7   : > { %173 = sbr.rel (%p170_p3) target bundleno = 217 (0xd9), region = 32  ;;  %p204_p4 = scmp.lt.s32.totalorder (!%p170_p3), %s702_s18, 63 }
   0xc   : > { %v813_v0 = vld [vmem:[%s1073_s1 + $0x8] sm:$0xff]  ;;  %v812_v1 = vld [vmem:[%s1073_s1] sm:$0xff]  ;;  %s1081_s18 = smov (!%p204_p4, %s702_s18), 63  ;;  %vm358_vm0 = vcmask 261120   ;;  %vm560_vm1 = vcmask 125952  }
   0xd   : > { %413 = vmatpush.bf16.msra.mxu0 %v813_v0  ;;  %814 = vmatpush.bf16.msra.mxu1 %v813_v0  ;;  %s703_s21 = sshll.u32 %s1081_s18, 2  ;;  %v958_v18 = vld [vmem:[%s1074_s2] ss:$0 sm:$0xff] }
   0xe   : > { %815 = vmatpush.bf16.msra.mxu2 %v813_v0  ;;  %816 = vmatpush.bf16.msra.mxu3 %v813_v0  ;;  %s921_s24 = scalar_lea.vmem %s1072_s0, %s703_s21  ;;  %s967_s29 = scalar_lea.vmem %s1075_s3, %s703_s21 }
   0xf   : > { %v796_v2 = vld [vmem:[%s921_s24] sm:$0xff]  ;;  %v797_v6 = vld [vmem:[%s921_s24 + $0x8] sm:$0xff]  ;;  %v798_v10 = vld [vmem:[%s921_s24 + $0x10] sm:$0xff] }
  0x10   : > { %v800_v3 = vld [vmem:[%s921_s24 + $0x20] sm:$0xff]  ;;  %v801_v7 = vld [vmem:[%s921_s24 + $0x28] sm:$0xff]  ;;  %v802_v11 = vld [vmem:[%s921_s24 + $0x30] sm:$0xff] }
  0x11   : > { %414 = vmatpush.bf16.msra.mxu0 %v812_v1  ;;  %817 = vmatpush.bf16.msra.mxu1 %v812_v1  ;;  %v804_v4 = vld [vmem:[%s921_s24 + $0x40] sm:$0xff]  ;;  %v805_v8 = vld [vmem:[%s921_s24 + $0x48] sm:$0xff]  ;;  %v806_v12 = vld [vmem:[%s921_s24 + $0x50] sm:$0xff] }
  0x12   : > { %818 = vmatpush.bf16.msra.mxu2 %v812_v1  ;;  %819 = vmatpush.bf16.msra.mxu3 %v812_v1  ;;  %v808_v5 = vld [vmem:[%s921_s24 + $0x60] sm:$0xff]  ;;  %v809_v9 = vld [vmem:[%s921_s24 + $0x68] sm:$0xff]  ;;  %v810_v13 = vld [vmem:[%s921_s24 + $0x70] sm:$0xff] }
  0x13   : > { %v799_v14 = vld [vmem:[%s921_s24 + $0x18] sm:$0xff] }
  0x14   : > { %778 = vmatmul.msk.bf16.vlgmr.msra.gmra.mxu0 %vm358_vm0, %v796_v2  ;;  %782 = vmatmul.msk.bf16.vlgmr.msra.gmra.mxu1 %vm358_vm0, %v800_v3  ;;  %v803_v15 = vld [vmem:[%s921_s24 + $0x38] sm:$0xff] }
  0x15   : > { %786 = vmatmul.msk.bf16.vlgmr.msra.gmra.mxu2 %vm358_vm0, %v804_v4  ;;  %790 = vmatmul.msk.bf16.vlgmr.msra.gmra.mxu3 %vm358_vm0, %v808_v5  ;;  %v807_v16 = vld [vmem:[%s921_s24 + $0x58] sm:$0xff] }
  0x16   : > { %v811_v17 = vld [vmem:[%s921_s24 + $0x78] sm:$0xff] }
  0x24   : > { %779 = vmatmul.msk.bf16.gmra.mxu0 %vm358_vm0, %v797_v6  ;;  %783 = vmatmul.msk.bf16.gmra.mxu1 %vm358_vm0, %v801_v7 }
  0x25   : > { %787 = vmatmul.msk.bf16.gmra.mxu2 %vm358_vm0, %v805_v8  ;;  %791 = vmatmul.msk.bf16.gmra.mxu3 %vm358_vm0, %v809_v9 }
  0x34   : > { %780 = vmatmul.msk.bf16.gmra.mxu0 %vm358_vm0, %v798_v10  ;;  %784 = vmatmul.msk.bf16.gmra.mxu1 %vm358_vm0, %v802_v11 }
  0x35   : > { %788 = vmatmul.msk.bf16.gmra.mxu2 %vm358_vm0, %v806_v12  ;;  %792 = vmatmul.msk.bf16.gmra.mxu3 %vm358_vm0, %v810_v13 }
  0x44   : > { %781 = vmatmul.msk.bf16.gmra.mxu0 %vm358_vm0, %v799_v14  ;;  %785 = vmatmul.msk.bf16.gmra.mxu1 %vm358_vm0, %v803_v15 }
  0x45   : > { %789 = vmatmul.msk.bf16.gmra.mxu2 %vm358_vm0, %v807_v16  ;;  %793 = vmatmul.msk.bf16.gmra.mxu3 %vm358_vm0, %v811_v17 }
  0x91   : > { %v416_v19 = vpop.f32.mrf.mxu0  ;;  %v436_v20 = vpop.f32.mrf.mxu1 }
  0x92   : > { %v417_v21 = vadd.f32 %v958_v18, %v416_v19  ;;  %v437_v22 = vadd.f32 %v958_v18, %v436_v20 }
  0x94   : > { %v496_v23 = vmax.f32 %v417_v21, 0.0  ;;  %v504_v24 = vmax.f32 %v437_v22, 0.0 }
  0x96   : > { %v528_v25 = vpack.c.bf16 %v496_v23, %v496_v23  ;;  %v536_v26 = vpack.c.bf16 %v504_v24, %v504_v24 }
  0x98   : > { %561 = vst.msk [vmem:[%s967_s29] sm:$0xf] %vm560_vm1, %v528_v25  ;;  %v456_v27 = vpop.f32.mrf.mxu2  ;;  %v476_v28 = vpop.f32.mrf.mxu3 }
  0x99   : > { %569 = vst.msk [vmem:[%s967_s29 + $0x20] sm:$0xf] %vm560_vm1, %v536_v26  ;;  %v457_v29 = vadd.f32 %v958_v18, %v456_v27  ;;  %v477_v30 = vadd.f32 %v958_v18, %v476_v28  ;;  %v418_v31 = vpop.f32.mrf.mxu0  ;;  %v438_v32 = vpop.f32.mrf.mxu1 }
  0x9a   : > { %v419_v33 = vadd.f32 %v958_v18, %v418_v31  ;;  %v439_v34 = vadd.f32 %v958_v18, %v438_v32 }
  0x9b   : > { %v512_v35 = vmax.f32 %v457_v29, 0.0  ;;  %v520_v36 = vmax.f32 %v477_v30, 0.0 }
  0x9c   : > { %v497_v37 = vmax.f32 %v419_v33, 0.0  ;;  %v505_v38 = vmax.f32 %v439_v34, 0.0 }
  0x9d   : > { %v544_v39 = vpack.c.bf16 %v512_v35, %v512_v35  ;;  %v552_v40 = vpack.c.bf16 %v520_v36, %v520_v36 }
  0x9e   : > { %v529_v41 = vpack.c.bf16 %v497_v37, %v497_v37  ;;  %v537_v42 = vpack.c.bf16 %v505_v38, %v505_v38 }
  0x9f   : > { %577 = vst.msk [vmem:[%s967_s29 + $0x40] sm:$0xf] %vm560_vm1, %v544_v39 }
  0xa0   : > { %585 = vst.msk [vmem:[%s967_s29 + $0x60] sm:$0xf] %vm560_vm1, %v552_v40  ;;  %v458_v43 = vpop.f32.mrf.mxu2  ;;  %v478_v44 = vpop.f32.mrf.mxu3 }
  0xa1   : > { %562 = vst.msk [vmem:[%s967_s29 + $0x4] sm:$0xf] %vm560_vm1, %v529_v41  ;;  %v459_v45 = vadd.f32 %v958_v18, %v458_v43  ;;  %v479_v46 = vadd.f32 %v958_v18, %v478_v44  ;;  %v421_v47 = vpop.f32.mrf.mxu0  ;;  %v441_v48 = vpop.f32.mrf.mxu1 }
  0xa2   : > { %570 = vst.msk [vmem:[%s967_s29 + $0x24] sm:$0xf] %vm560_vm1, %v537_v42  ;;  %v422_v49 = vadd.f32 %v958_v18, %v421_v47  ;;  %v442_v50 = vadd.f32 %v958_v18, %v441_v48 }
  0xa3   : > { %v513_v51 = vmax.f32 %v459_v45, 0.0  ;;  %v521_v52 = vmax.f32 %v479_v46, 0.0 }
  0xa4   : > { %v498_v53 = vmax.f32 %v422_v49, 0.0  ;;  %v506_v54 = vmax.f32 %v442_v50, 0.0 }
  0xa5   : > { %v545_v55 = vpack.c.bf16 %v513_v51, %v513_v51  ;;  %v553_v56 = vpack.c.bf16 %v521_v52, %v521_v52 }
  0xa6   : > { %v530_v57 = vpack.c.bf16 %v498_v53, %v498_v53  ;;  %v538_v58 = vpack.c.bf16 %v506_v54, %v506_v54 }
  0xa7   : > { %578 = vst.msk [vmem:[%s967_s29 + $0x44] sm:$0xf] %vm560_vm1, %v545_v55 }
  0xa8   : > { %586 = vst.msk [vmem:[%s967_s29 + $0x64] sm:$0xf] %vm560_vm1, %v553_v56  ;;  %v461_v59 = vpop.f32.mrf.mxu2  ;;  %v481_v60 = vpop.f32.mrf.mxu3 }
  0xa9   : > { %563 = vst.msk [vmem:[%s967_s29 + $0x8] sm:$0xf] %vm560_vm1, %v530_v57  ;;  %v462_v61 = vadd.f32 %v958_v18, %v461_v59  ;;  %v482_v62 = vadd.f32 %v958_v18, %v481_v60  ;;  %v423_v63 = vpop.f32.mrf.mxu0  ;;  %v443_v0 = vpop.f32.mrf.mxu1 }
  0xaa   : > { %571 = vst.msk [vmem:[%s967_s29 + $0x28] sm:$0xf] %vm560_vm1, %v538_v58  ;;  %v424_v1 = vadd.f32 %v958_v18, %v423_v63  ;;  %v444_v2 = vadd.f32 %v958_v18, %v443_v0 }
  0xab   : > { %v514_v3 = vmax.f32 %v462_v61, 0.0  ;;  %v522_v4 = vmax.f32 %v482_v62, 0.0 }
  0xac   : > { %v499_v5 = vmax.f32 %v424_v1, 0.0  ;;  %v507_v6 = vmax.f32 %v444_v2, 0.0 }
  0xad   : > { %v546_v7 = vpack.c.bf16 %v514_v3, %v514_v3  ;;  %v554_v8 = vpack.c.bf16 %v522_v4, %v522_v4 }
  0xae   : > { %v531_v9 = vpack.c.bf16 %v499_v5, %v499_v5  ;;  %v539_v10 = vpack.c.bf16 %v507_v6, %v507_v6 }
  0xaf   : > { %579 = vst.msk [vmem:[%s967_s29 + $0x48] sm:$0xf] %vm560_vm1, %v546_v7 }
  0xb0   : > { %587 = vst.msk [vmem:[%s967_s29 + $0x68] sm:$0xf] %vm560_vm1, %v554_v8  ;;  %v463_v11 = vpop.f32.mrf.mxu2  ;;  %v483_v12 = vpop.f32.mrf.mxu3 }
  0xb1   : > { %564 = vst.msk [vmem:[%s967_s29 + $0xc] sm:$0xf] %vm560_vm1, %v531_v9  ;;  %v464_v13 = vadd.f32 %v958_v18, %v463_v11  ;;  %v484_v14 = vadd.f32 %v958_v18, %v483_v12  ;;  %v426_v15 = vpop.f32.mrf.mxu0  ;;  %v446_v16 = vpop.f32.mrf.mxu1 }
  0xb2   : > { %572 = vst.msk [vmem:[%s967_s29 + $0x2c] sm:$0xf] %vm560_vm1, %v539_v10  ;;  %v427_v17 = vadd.f32 %v958_v18, %v426_v15  ;;  %v447_v19 = vadd.f32 %v958_v18, %v446_v16 }
  0xb3   : > { %v515_v20 = vmax.f32 %v464_v13, 0.0  ;;  %v523_v21 = vmax.f32 %v484_v14, 0.0 }
  0xb4   : > { %v500_v22 = vmax.f32 %v427_v17, 0.0  ;;  %v508_v23 = vmax.f32 %v447_v19, 0.0 }
  0xb5   : > { %v547_v24 = vpack.c.bf16 %v515_v20, %v515_v20  ;;  %v555_v25 = vpack.c.bf16 %v523_v21, %v523_v21 }
  0xb6   : > { %v532_v26 = vpack.c.bf16 %v500_v22, %v500_v22  ;;  %v540_v27 = vpack.c.bf16 %v508_v23, %v508_v23 }
  0xb7   : > { %580 = vst.msk [vmem:[%s967_s29 + $0x4c] sm:$0xf] %vm560_vm1, %v547_v24 }
  0xb8   : > { %588 = vst.msk [vmem:[%s967_s29 + $0x6c] sm:$0xf] %vm560_vm1, %v555_v25  ;;  %v466_v28 = vpop.f32.mrf.mxu2  ;;  %v486_v29 = vpop.f32.mrf.mxu3 }
  0xb9   : > { %565 = vst.msk [vmem:[%s967_s29 + $0x10] sm:$0xf] %vm560_vm1, %v532_v26  ;;  %v467_v30 = vadd.f32 %v958_v18, %v466_v28  ;;  %v487_v31 = vadd.f32 %v958_v18, %v486_v29  ;;  %v428_v32 = vpop.f32.mrf.mxu0  ;;  %v448_v33 = vpop.f32.mrf.mxu1 }
  0xba   : > { %573 = vst.msk [vmem:[%s967_s29 + $0x30] sm:$0xf] %vm560_vm1, %v540_v27  ;;  %v429_v34 = vadd.f32 %v958_v18, %v428_v32  ;;  %v449_v35 = vadd.f32 %v958_v18, %v448_v33 }
  0xbb   : > { %v516_v36 = vmax.f32 %v467_v30, 0.0  ;;  %v524_v37 = vmax.f32 %v487_v31, 0.0 }
  0xbc   : > { %v501_v38 = vmax.f32 %v429_v34, 0.0  ;;  %v509_v39 = vmax.f32 %v449_v35, 0.0 }
  0xbd   : > { %v548_v40 = vpack.c.bf16 %v516_v36, %v516_v36  ;;  %v556_v41 = vpack.c.bf16 %v524_v37, %v524_v37 }
  0xbe   : > { %v533_v42 = vpack.c.bf16 %v501_v38, %v501_v38  ;;  %v541_v43 = vpack.c.bf16 %v509_v39, %v509_v39 }
  0xbf   : > { %581 = vst.msk [vmem:[%s967_s29 + $0x50] sm:$0xf] %vm560_vm1, %v548_v40 }
  0xc0   : > { %589 = vst.msk [vmem:[%s967_s29 + $0x70] sm:$0xf] %vm560_vm1, %v556_v41  ;;  %v468_v44 = vpop.f32.mrf.mxu2  ;;  %v488_v45 = vpop.f32.mrf.mxu3 }
  0xc1   : > { %566 = vst.msk [vmem:[%s967_s29 + $0x14] sm:$0xf] %vm560_vm1, %v533_v42  ;;  %v469_v46 = vadd.f32 %v958_v18, %v468_v44  ;;  %v489_v47 = vadd.f32 %v958_v18, %v488_v45  ;;  %v431_v48 = vpop.f32.mrf.mxu0  ;;  %v451_v49 = vpop.f32.mrf.mxu1 }
  0xc2   : > { %574 = vst.msk [vmem:[%s967_s29 + $0x34] sm:$0xf] %vm560_vm1, %v541_v43  ;;  %v432_v50 = vadd.f32 %v958_v18, %v431_v48  ;;  %v452_v51 = vadd.f32 %v958_v18, %v451_v49 }
  0xc3   : > { %v517_v52 = vmax.f32 %v469_v46, 0.0  ;;  %v525_v53 = vmax.f32 %v489_v47, 0.0 }
  0xc4   : > { %v502_v54 = vmax.f32 %v432_v50, 0.0  ;;  %v510_v55 = vmax.f32 %v452_v51, 0.0 }
  0xc5   : > { %v549_v56 = vpack.c.bf16 %v517_v52, %v517_v52  ;;  %v557_v57 = vpack.c.bf16 %v525_v53, %v525_v53 }
  0xc6   : > { %v534_v58 = vpack.c.bf16 %v502_v54, %v502_v54  ;;  %v542_v59 = vpack.c.bf16 %v510_v55, %v510_v55 }
  0xc7   : > { %582 = vst.msk [vmem:[%s967_s29 + $0x54] sm:$0xf] %vm560_vm1, %v549_v56 }
  0xc8   : > { %590 = vst.msk [vmem:[%s967_s29 + $0x74] sm:$0xf] %vm560_vm1, %v557_v57  ;;  %v471_v60 = vpop.f32.mrf.mxu2  ;;  %v491_v61 = vpop.f32.mrf.mxu3 }
  0xc9   : > { %567 = vst.msk [vmem:[%s967_s29 + $0x18] sm:$0xf] %vm560_vm1, %v534_v58  ;;  %v472_v62 = vadd.f32 %v958_v18, %v471_v60  ;;  %v492_v63 = vadd.f32 %v958_v18, %v491_v61  ;;  %v433_v0 = vpop.f32.mrf.mxu0  ;;  %v453_v1 = vpop.f32.mrf.mxu1 }
  0xca   : > { %575 = vst.msk [vmem:[%s967_s29 + $0x38] sm:$0xf] %vm560_vm1, %v542_v59  ;;  %v434_v2 = vadd.f32 %v958_v18, %v433_v0  ;;  %v454_v3 = vadd.f32 %v958_v18, %v453_v1 }
  0xcb   : > { %v518_v4 = vmax.f32 %v472_v62, 0.0  ;;  %v526_v5 = vmax.f32 %v492_v63, 0.0 }
  0xcc   : > { %v503_v6 = vmax.f32 %v434_v2, 0.0  ;;  %v511_v7 = vmax.f32 %v454_v3, 0.0 }
  0xcd   : > { %v550_v8 = vpack.c.bf16 %v518_v4, %v518_v4  ;;  %v558_v9 = vpack.c.bf16 %v526_v5, %v526_v5 }
  0xce   : > { %v535_v10 = vpack.c.bf16 %v503_v6, %v503_v6  ;;  %v543_v11 = vpack.c.bf16 %v511_v7, %v511_v7 }
  0xcf   : > { %583 = vst.msk [vmem:[%s967_s29 + $0x58] sm:$0xf] %vm560_vm1, %v550_v8 }
  0xd0   : > { %591 = vst.msk [vmem:[%s967_s29 + $0x78] sm:$0xf] %vm560_vm1, %v558_v9  ;;  %v473_v12 = vpop.f32.mrf.mxu2  ;;  %v493_v13 = vpop.f32.mrf.mxu3 }
  0xd1   : > { %568 = vst.msk [vmem:[%s967_s29 + $0x1c] sm:$0xf] %vm560_vm1, %v535_v10  ;;  %v474_v14 = vadd.f32 %v958_v18, %v473_v12  ;;  %v494_v15 = vadd.f32 %v958_v18, %v493_v13 }
  0xd2   : > { %576 = vst.msk [vmem:[%s967_s29 + $0x3c] sm:$0xf] %vm560_vm1, %v543_v11 }
  0xd3   : > { %v519_v16 = vmax.f32 %v474_v14, 0.0  ;;  %v527_v17 = vmax.f32 %v494_v15, 0.0 }
  0xd5   : > { %v551_v19 = vpack.c.bf16 %v519_v16, %v519_v16  ;;  %v559_v20 = vpack.c.bf16 %v527_v17, %v527_v17 }
  0xd7   : > { %584 = vst.msk [vmem:[%s967_s29 + $0x5c] sm:$0xf] %vm560_vm1, %v551_v19 }
  0xd8   : > { %592 = vst.msk [vmem:[%s967_s29 + $0x7c] sm:$0xf] %vm560_vm1, %v559_v20 }
  0xd9 PF: > { %s13_s14 = sadd.s32 1, %s867_s14   ;;  %s1076_s12 = smov %s863_s13 }
  0xda   : > { %p10_p5 = scmp.ge.s32.totalorder %s13_s14, 4   ;;  %s1077_s13 = smov %s1079_s15 }
  0xdc   :  { %12 = sbr.rel (!%p10_p5) target bundleno = 2 (0x2), region = 68 }

// kernel: bottleneck_forward.6
= control target key start
LH: loop header
LB: loop body
LE: loop exit
PB: predicated region body
PF: predicated region fallthrough
CT: control target
= control target key end

     0   :  { %s857_s12 = smov 0   ;;  %s859_s13 = smov 0   ;;  %s1040_s0 = inlined_call_operand.vmem [shape: bf16[512,32], index: 0, kind: input, shape index: {}]   ;;  %s1041_s1 = inlined_call_operand.vmem [shape: bf16[32,64], index: 1, kind: input, shape index: {}]   ;;  %s1042_s2 = inlined_call_operand.vmem [shape: f32[1,64], index: 2, kind: input, shape index: {}]   ;;  %s1043_s3 = inlined_call_operand.vmem [shape: bf16[512,64], index: 3, kind: output, shape index: {}]  }
   0x1   :  { %s861_s14 = smov 0  }
   0x2 LB: > { %s25_s15 = sadd.s32 1, %s831_s13  ;;  %p669_p0 = scmp.ge.s32.totalorder %s835_s14, 1  ;;  %s835_s14 = sphi %s861_s14, %s13_s14   ;;  %s831_s13 = sphi %s859_s13, %s1045_s13   ;;  %s827_s12 = sphi %s857_s12, %s1044_s12  }
   0x3   : > { %p27_p1 = scmp.ge.s32.totalorder %s25_s15, 2  ;;  %p169_p2 = scmp.lt.s32.totalorder %s835_s14, 3 }
   0x5   : > { %s1047_s15 = smov (%p27_p1, %s25_s15), 0  ;;  %p170_p3 = pnand %p669_p0, %p169_p2 }
   0x6   : > { %s670_s18 = sshll.u32 (!%p170_p3), %s827_s12, 5 }
   0x7   : > { %173 = sbr.rel (%p170_p3) target bundleno = 215 (0xd7), region = 32  ;;  %p204_p4 = scmp.lt.s32.totalorder (!%p170_p3), %s670_s18, 63 }
   0xc   : > { %v781_v0 = vld [vmem:[%s1041_s1 + $0x8] sm:$0xff]  ;;  %v780_v1 = vld [vmem:[%s1041_s1] sm:$0xff]  ;;  %s1049_s18 = smov (!%p204_p4, %s670_s18), 63  ;;  %vm358_vm0 = vcmask 261120   ;;  %vm528_vm1 = vcmask 519168  }
   0xd   : > { %413 = vmatpush.bf16.msra.mxu0 %v781_v0  ;;  %782 = vmatpush.bf16.msra.mxu1 %v781_v0  ;;  %s671_s21 = sshll.u32 %s1049_s18, 2  ;;  %v926_v18 = vld [vmem:[%s1042_s2] ss:$0 sm:$0xff] }
   0xe   : > { %783 = vmatpush.bf16.msra.mxu2 %v781_v0  ;;  %784 = vmatpush.bf16.msra.mxu3 %v781_v0  ;;  %s889_s24 = scalar_lea.vmem %s1040_s0, %s671_s21  ;;  %s935_s29 = scalar_lea.vmem %s1043_s3, %s671_s21 }
   0xf   : > { %v764_v2 = vld [vmem:[%s889_s24] sm:$0xff]  ;;  %v765_v6 = vld [vmem:[%s889_s24 + $0x8] sm:$0xff]  ;;  %v766_v10 = vld [vmem:[%s889_s24 + $0x10] sm:$0xff] }
  0x10   : > { %v768_v3 = vld [vmem:[%s889_s24 + $0x20] sm:$0xff]  ;;  %v769_v7 = vld [vmem:[%s889_s24 + $0x28] sm:$0xff]  ;;  %v770_v11 = vld [vmem:[%s889_s24 + $0x30] sm:$0xff] }
  0x11   : > { %414 = vmatpush.bf16.msra.mxu0 %v780_v1  ;;  %785 = vmatpush.bf16.msra.mxu1 %v780_v1  ;;  %v772_v4 = vld [vmem:[%s889_s24 + $0x40] sm:$0xff]  ;;  %v773_v8 = vld [vmem:[%s889_s24 + $0x48] sm:$0xff]  ;;  %v774_v12 = vld [vmem:[%s889_s24 + $0x50] sm:$0xff] }
  0x12   : > { %786 = vmatpush.bf16.msra.mxu2 %v780_v1  ;;  %787 = vmatpush.bf16.msra.mxu3 %v780_v1  ;;  %v776_v5 = vld [vmem:[%s889_s24 + $0x60] sm:$0xff]  ;;  %v777_v9 = vld [vmem:[%s889_s24 + $0x68] sm:$0xff]  ;;  %v778_v13 = vld [vmem:[%s889_s24 + $0x70] sm:$0xff] }
  0x13   : > { %v767_v14 = vld [vmem:[%s889_s24 + $0x18] sm:$0xff] }
  0x14   : > { %746 = vmatmul.msk.bf16.vlgmr.msra.gmra.mxu0 %vm358_vm0, %v764_v2  ;;  %750 = vmatmul.msk.bf16.vlgmr.msra.gmra.mxu1 %vm358_vm0, %v768_v3  ;;  %v771_v15 = vld [vmem:[%s889_s24 + $0x38] sm:$0xff] }
  0x15   : > { %754 = vmatmul.msk.bf16.vlgmr.msra.gmra.mxu2 %vm358_vm0, %v772_v4  ;;  %758 = vmatmul.msk.bf16.vlgmr.msra.gmra.mxu3 %vm358_vm0, %v776_v5  ;;  %v775_v16 = vld [vmem:[%s889_s24 + $0x58] sm:$0xff] }
  0x16   : > { %v779_v17 = vld [vmem:[%s889_s24 + $0x78] sm:$0xff] }
  0x24   : > { %747 = vmatmul.msk.bf16.gmra.mxu0 %vm358_vm0, %v765_v6  ;;  %751 = vmatmul.msk.bf16.gmra.mxu1 %vm358_vm0, %v769_v7 }
  0x25   : > { %755 = vmatmul.msk.bf16.gmra.mxu2 %vm358_vm0, %v773_v8  ;;  %759 = vmatmul.msk.bf16.gmra.mxu3 %vm358_vm0, %v777_v9 }
  0x34   : > { %748 = vmatmul.msk.bf16.gmra.mxu0 %vm358_vm0, %v766_v10  ;;  %752 = vmatmul.msk.bf16.gmra.mxu1 %vm358_vm0, %v770_v11 }
  0x35   : > { %756 = vmatmul.msk.bf16.gmra.mxu2 %vm358_vm0, %v774_v12  ;;  %760 = vmatmul.msk.bf16.gmra.mxu3 %vm358_vm0, %v778_v13 }
  0x44   : > { %749 = vmatmul.msk.bf16.gmra.mxu0 %vm358_vm0, %v767_v14  ;;  %753 = vmatmul.msk.bf16.gmra.mxu1 %vm358_vm0, %v771_v15 }
  0x45   : > { %757 = vmatmul.msk.bf16.gmra.mxu2 %vm358_vm0, %v775_v16  ;;  %761 = vmatmul.msk.bf16.gmra.mxu3 %vm358_vm0, %v779_v17 }
  0x91   : > { %v416_v19 = vpop.f32.mrf.mxu0  ;;  %v436_v20 = vpop.f32.mrf.mxu1 }
  0x92   : > { %v417_v21 = vadd.f32 %v926_v18, %v416_v19  ;;  %v437_v22 = vadd.f32 %v926_v18, %v436_v20 }
  0x94   : > { %v496_v23 = vpack.c.bf16 %v417_v21, %v417_v21  ;;  %v504_v24 = vpack.c.bf16 %v437_v22, %v437_v22 }
  0x96   : > { %529 = vst.msk [vmem:[%s935_s29] sm:$0xf] %vm528_vm1, %v496_v23 }
  0x97   : > { %537 = vst.msk [vmem:[%s935_s29 + $0x20] sm:$0xf] %vm528_vm1, %v504_v24 }
  0x98   : > { %v456_v25 = vpop.f32.mrf.mxu2  ;;  %v476_v26 = vpop.f32.mrf.mxu3 }
  0x99   : > { %v457_v27 = vadd.f32 %v926_v18, %v456_v25  ;;  %v477_v28 = vadd.f32 %v926_v18, %v476_v26  ;;  %v418_v29 = vpop.f32.mrf.mxu0  ;;  %v438_v30 = vpop.f32.mrf.mxu1 }
  0x9a   : > { %v419_v31 = vadd.f32 %v926_v18, %v418_v29  ;;  %v439_v32 = vadd.f32 %v926_v18, %v438_v30 }
  0x9b   : > { %v512_v33 = vpack.c.bf16 %v457_v27, %v457_v27  ;;  %v520_v34 = vpack.c.bf16 %v477_v28, %v477_v28 }
  0x9c   : > { %v497_v35 = vpack.c.bf16 %v419_v31, %v419_v31  ;;  %v505_v36 = vpack.c.bf16 %v439_v32, %v439_v32 }
  0x9d   : > { %545 = vst.msk [vmem:[%s935_s29 + $0x40] sm:$0xf] %vm528_vm1, %v512_v33 }
  0x9e   : > { %553 = vst.msk [vmem:[%s935_s29 + $0x60] sm:$0xf] %vm528_vm1, %v520_v34 }
  0x9f   : > { %530 = vst.msk [vmem:[%s935_s29 + $0x4] sm:$0xf] %vm528_vm1, %v497_v35 }
  0xa0   : > { %538 = vst.msk [vmem:[%s935_s29 + $0x24] sm:$0xf] %vm528_vm1, %v505_v36  ;;  %v458_v37 = vpop.f32.mrf.mxu2  ;;  %v478_v38 = vpop.f32.mrf.mxu3 }
  0xa1   : > { %v459_v39 = vadd.f32 %v926_v18, %v458_v37  ;;  %v479_v40 = vadd.f32 %v926_v18, %v478_v38  ;;  %v421_v41 = vpop.f32.mrf.mxu0  ;;  %v441_v42 = vpop.f32.mrf.mxu1 }
  0xa2   : > { %v422_v43 = vadd.f32 %v926_v18, %v421_v41  ;;  %v442_v44 = vadd.f32 %v926_v18, %v441_v42 }
  0xa3   : > { %v513_v45 = vpack.c.bf16 %v459_v39, %v459_v39  ;;  %v521_v46 = vpack.c.bf16 %v479_v40, %v479_v40 }
  0xa4   : > { %v498_v47 = vpack.c.bf16 %v422_v43, %v422_v43  ;;  %v506_v48 = vpack.c.bf16 %v442_v44, %v442_v44 }
  0xa5   : > { %546 = vst.msk [vmem:[%s935_s29 + $0x44] sm:$0xf] %vm528_vm1, %v513_v45 }
  0xa6   : > { %554 = vst.msk [vmem:[%s935_s29 + $0x64] sm:$0xf] %vm528_vm1, %v521_v46 }
  0xa7   : > { %531 = vst.msk [vmem:[%s935_s29 + $0x8] sm:$0xf] %vm528_vm1, %v498_v47 }
  0xa8   : > { %539 = vst.msk [vmem:[%s935_s29 + $0x28] sm:$0xf] %vm528_vm1, %v506_v48  ;;  %v461_v49 = vpop.f32.mrf.mxu2  ;;  %v481_v50 = vpop.f32.mrf.mxu3 }
  0xa9   : > { %v462_v51 = vadd.f32 %v926_v18, %v461_v49  ;;  %v482_v52 = vadd.f32 %v926_v18, %v481_v50  ;;  %v423_v53 = vpop.f32.mrf.mxu0  ;;  %v443_v54 = vpop.f32.mrf.mxu1 }
  0xaa   : > { %v424_v55 = vadd.f32 %v926_v18, %v423_v53  ;;  %v444_v56 = vadd.f32 %v926_v18, %v443_v54 }
  0xab   : > { %v514_v57 = vpack.c.bf16 %v462_v51, %v462_v51  ;;  %v522_v58 = vpack.c.bf16 %v482_v52, %v482_v52 }
  0xac   : > { %v499_v59 = vpack.c.bf16 %v424_v55, %v424_v55  ;;  %v507_v60 = vpack.c.bf16 %v444_v56, %v444_v56 }
  0xad   : > { %547 = vst.msk [vmem:[%s935_s29 + $0x48] sm:$0xf] %vm528_vm1, %v514_v57 }
  0xae   : > { %555 = vst.msk [vmem:[%s935_s29 + $0x68] sm:$0xf] %vm528_vm1, %v522_v58 }
  0xaf   : > { %532 = vst.msk [vmem:[%s935_s29 + $0xc] sm:$0xf] %vm528_vm1, %v499_v59 }
  0xb0   : > { %540 = vst.msk [vmem:[%s935_s29 + $0x2c] sm:$0xf] %vm528_vm1, %v507_v60  ;;  %v463_v61 = vpop.f32.mrf.mxu2  ;;  %v483_v62 = vpop.f32.mrf.mxu3 }
  0xb1   : > { %v464_v63 = vadd.f32 %v926_v18, %v463_v61  ;;  %v484_v0 = vadd.f32 %v926_v18, %v483_v62  ;;  %v426_v1 = vpop.f32.mrf.mxu0  ;;  %v446_v2 = vpop.f32.mrf.mxu1 }
  0xb2   : > { %v427_v3 = vadd.f32 %v926_v18, %v426_v1  ;;  %v447_v4 = vadd.f32 %v926_v18, %v446_v2 }
  0xb3   : > { %v515_v5 = vpack.c.bf16 %v464_v63, %v464_v63  ;;  %v523_v6 = vpack.c.bf16 %v484_v0, %v484_v0 }
  0xb4   : > { %v500_v7 = vpack.c.bf16 %v427_v3, %v427_v3  ;;  %v508_v8 = vpack.c.bf16 %v447_v4, %v447_v4 }
  0xb5   : > { %548 = vst.msk [vmem:[%s935_s29 + $0x4c] sm:$0xf] %vm528_vm1, %v515_v5 }
  0xb6   : > { %556 = vst.msk [vmem:[%s935_s29 + $0x6c] sm:$0xf] %vm528_vm1, %v523_v6 }
  0xb7   : > { %533 = vst.msk [vmem:[%s935_s29 + $0x10] sm:$0xf] %vm528_vm1, %v500_v7 }
  0xb8   : > { %541 = vst.msk [vmem:[%s935_s29 + $0x30] sm:$0xf] %vm528_vm1, %v508_v8  ;;  %v466_v9 = vpop.f32.mrf.mxu2  ;;  %v486_v10 = vpop.f32.mrf.mxu3 }
  0xb9   : > { %v467_v11 = vadd.f32 %v926_v18, %v466_v9  ;;  %v487_v12 = vadd.f32 %v926_v18, %v486_v10  ;;  %v428_v13 = vpop.f32.mrf.mxu0  ;;  %v448_v14 = vpop.f32.mrf.mxu1 }
  0xba   : > { %v429_v15 = vadd.f32 %v926_v18, %v428_v13  ;;  %v449_v16 = vadd.f32 %v926_v18, %v448_v14 }
  0xbb   : > { %v516_v17 = vpack.c.bf16 %v467_v11, %v467_v11  ;;  %v524_v19 = vpack.c.bf16 %v487_v12, %v487_v12 }
  0xbc   : > { %v501_v20 = vpack.c.bf16 %v429_v15, %v429_v15  ;;  %v509_v21 = vpack.c.bf16 %v449_v16, %v449_v16 }
  0xbd   : > { %549 = vst.msk [vmem:[%s935_s29 + $0x50] sm:$0xf] %vm528_vm1, %v516_v17 }
  0xbe   : > { %557 = vst.msk [vmem:[%s935_s29 + $0x70] sm:$0xf] %vm528_vm1, %v524_v19 }
  0xbf   : > { %534 = vst.msk [vmem:[%s935_s29 + $0x14] sm:$0xf] %vm528_vm1, %v501_v20 }
  0xc0   : > { %542 = vst.msk [vmem:[%s935_s29 + $0x34] sm:$0xf] %vm528_vm1, %v509_v21  ;;  %v468_v22 = vpop.f32.mrf.mxu2  ;;  %v488_v23 = vpop.f32.mrf.mxu3 }
  0xc1   : > { %v469_v24 = vadd.f32 %v926_v18, %v468_v22  ;;  %v489_v25 = vadd.f32 %v926_v18, %v488_v23  ;;  %v431_v26 = vpop.f32.mrf.mxu0  ;;  %v451_v27 = vpop.f32.mrf.mxu1 }
  0xc2   : > { %v432_v28 = vadd.f32 %v926_v18, %v431_v26  ;;  %v452_v29 = vadd.f32 %v926_v18, %v451_v27 }
  0xc3   : > { %v517_v30 = vpack.c.bf16 %v469_v24, %v469_v24  ;;  %v525_v31 = vpack.c.bf16 %v489_v25, %v489_v25 }
  0xc4   : > { %v502_v32 = vpack.c.bf16 %v432_v28, %v432_v28  ;;  %v510_v33 = vpack.c.bf16 %v452_v29, %v452_v29 }
  0xc5   : > { %550 = vst.msk [vmem:[%s935_s29 + $0x54] sm:$0xf] %vm528_vm1, %v517_v30 }
  0xc6   : > { %558 = vst.msk [vmem:[%s935_s29 + $0x74] sm:$0xf] %vm528_vm1, %v525_v31 }
  0xc7   : > { %535 = vst.msk [vmem:[%s935_s29 + $0x18] sm:$0xf] %vm528_vm1, %v502_v32 }
  0xc8   : > { %543 = vst.msk [vmem:[%s935_s29 + $0x38] sm:$0xf] %vm528_vm1, %v510_v33  ;;  %v471_v34 = vpop.f32.mrf.mxu2  ;;  %v491_v35 = vpop.f32.mrf.mxu3 }
  0xc9   : > { %v472_v36 = vadd.f32 %v926_v18, %v471_v34  ;;  %v492_v37 = vadd.f32 %v926_v18, %v491_v35  ;;  %v433_v38 = vpop.f32.mrf.mxu0  ;;  %v453_v39 = vpop.f32.mrf.mxu1 }
  0xca   : > { %v434_v40 = vadd.f32 %v926_v18, %v433_v38  ;;  %v454_v41 = vadd.f32 %v926_v18, %v453_v39 }
  0xcb   : > { %v518_v42 = vpack.c.bf16 %v472_v36, %v472_v36  ;;  %v526_v43 = vpack.c.bf16 %v492_v37, %v492_v37 }
  0xcc   : > { %v503_v44 = vpack.c.bf16 %v434_v40, %v434_v40  ;;  %v511_v45 = vpack.c.bf16 %v454_v41, %v454_v41 }
  0xcd   : > { %551 = vst.msk [vmem:[%s935_s29 + $0x58] sm:$0xf] %vm528_vm1, %v518_v42 }
  0xce   : > { %559 = vst.msk [vmem:[%s935_s29 + $0x78] sm:$0xf] %vm528_vm1, %v526_v43 }
  0xcf   : > { %536 = vst.msk [vmem:[%s935_s29 + $0x1c] sm:$0xf] %vm528_vm1, %v503_v44 }
  0xd0   : > { %544 = vst.msk [vmem:[%s935_s29 + $0x3c] sm:$0xf] %vm528_vm1, %v511_v45  ;;  %v473_v46 = vpop.f32.mrf.mxu2  ;;  %v493_v47 = vpop.f32.mrf.mxu3 }
  0xd1   : > { %v474_v48 = vadd.f32 %v926_v18, %v473_v46  ;;  %v494_v49 = vadd.f32 %v926_v18, %v493_v47 }
  0xd3   : > { %v519_v50 = vpack.c.bf16 %v474_v48, %v474_v48  ;;  %v527_v51 = vpack.c.bf16 %v494_v49, %v494_v49 }
  0xd5   : > { %552 = vst.msk [vmem:[%s935_s29 + $0x5c] sm:$0xf] %vm528_vm1, %v519_v50 }
  0xd6   : > { %560 = vst.msk [vmem:[%s935_s29 + $0x7c] sm:$0xf] %vm528_vm1, %v527_v51 }
  0xd7 PF: > { %s13_s14 = sadd.s32 1, %s835_s14   ;;  %s1044_s12 = smov %s831_s13 }
  0xd8   : > { %p10_p5 = scmp.ge.s32.totalorder %s13_s14, 4   ;;  %s1045_s13 = smov %s1047_s15 }
  0xda   :  { %12 = sbr.rel (!%p10_p5) target bundleno = 2 (0x2), region = 68 }

// kernel: bottleneck_forward.5
= control target key start
LH: loop header
LB: loop body
LE: loop exit
PB: predicated region body
PF: predicated region fallthrough
CT: control target
= control target key end

     0   :  { %s819_s12 = smov 0   ;;  %s821_s13 = smov 0   ;;  %s924_s0 = inlined_call_operand.vmem [shape: bf16[2,20,20,16], index: 0, kind: input, shape index: {}]   ;;  %s925_s1 = inlined_call_operand.vmem [shape: bf16[3,3,16,16], index: 1, kind: input, shape index: {}]   ;;  %s926_s2 = inlined_call_operand.vmem [shape: f32[1,16], index: 2, kind: input, shape index: {}]   ;;  %s927_s3 = inlined_call_operand.vmem [shape: bf16[2,16,16,16], index: 3, kind: output, shape index: {}]  }
   0x1   :  { %s823_s14 = smov 0   ;;  %s825_s15 = smov 0  }
   0x2   :  { %s827_s16 = smov 0  }
   0x3 LB: > { %s22_s17 = sadd.s32 1, %s789_s14  ;;  %s25_s18 = sadd.s32 1, %s793_s15  ;;  %s797_s16 = sphi %s827_s16, %s13_s16   ;;  %s793_s15 = sphi %s825_s15, %s931_s15   ;;  %s789_s14 = sphi %s823_s14, %s930_s14   ;;  %s785_s13 = sphi %s821_s13, %s929_s13   ;;  %s781_s12 = sphi %s819_s12, %s928_s12  }
   0x4   : > { %p23_p0 = scmp.ge.s32.totalorder %s22_s17, 16  ;;  %p617_p1 = scmp.ge.s32.totalorder %s797_s16, 1 }
   0x5   : > { %p151_p2 = scmp.lt.s32.totalorder %s797_s16, 33 }
   0x6   : > { %s933_s17 = smov (%p23_p0, %s22_s17), 0  ;;  %s935_s18 = smov (!%p23_p0, %s25_s18), %s793_s15 }
   0x7   : > { %p152_p3 = pnand %p617_p1, %p151_p2  ;;  %p27_p4 = scmp.ge.s32.totalorder %s935_s18, 2 }
   0x8   : > { %p179_p5 = scmp.lt.s32.totalorder (!%p152_p3), %s785_s13, 1  ;;  %s704_s8 = smul.u32 (!%p152_p3), 12, %s781_s12 }
   0x9   : > { %s937_s18 = smov (%p27_p4, %s935_s18), 0  ;;  %155 = sbr.rel (%p152_p3) target bundleno = 202 (0xca), region = 32 }
   0xa   : > { %p186_p6 = scmp.lt.s32.totalorder (!%p152_p3), %s781_s12, 15 }
   0xe   : > { %v707_v0 = vld [vmem:[%s925_s1 + $0x8] sm:$0xff]  ;;  %v706_v1 = vld [vmem:[%s925_s1] sm:$0xff]  ;;  %v708_v2 = vld [vmem:[%s925_s1 + $0x10] sm:$0xff]  ;;  %s939_s13 = smov (!%p179_p5, %s785_s13), 1  ;;  %vm223_vm0 = vcmask 130048   ;;  %vm213_vm1 = vcmask 1046528  }
   0xf   : > { %v710_v3 = vld [vmem:[%s925_s1 + $0x18] sm:$0xff]  ;;  %v711_v4 = vld [vmem:[%s925_s1 + $0x20] sm:$0xff]  ;;  %v714_v5 = vld [vmem:[%s925_s1 + $0x30] sm:$0xff]  ;;  %234 = vmatpush.bf16.msra.mxu0 %v707_v0  ;;  %257 = vmatpush.bf16.msra.mxu1 %v706_v1  ;;  %s717_s9 = smul.u32 240, %s939_s13  ;;  %vm267_vm2 = vcmask 1045504   ;;  %s941_s12 = smov (!%p186_p6, %s781_s12), 15 }
  0x10   : > { %v715_v6 = vld [vmem:[%s925_s1 + $0x38] sm:$0xff]  ;;  %v712_v7 = vld [vmem:[%s925_s1 + $0x28] sm:$0xff]  ;;  %287 = vmatpush.bf16.msra.mxu2 %v708_v2  ;;  %327 = vmatpush.bf16.msra.mxu3 %v710_v3  ;;  %v716_v21 = vld [vmem:[%s925_s1 + $0x40] sm:$0xff]  ;;  %s619_s23 = sshll.u32 %s941_s12, 1  ;;  %s620_s24 = sshll.u32 %s939_s13, 5  ;;  %vm516_vm3 = vcmask 125952  }
  0x11   : > { %s183_s19 = scalar_lea.vmem %s924_s0, %s717_s9  ;;  %v758_v0 = vld [vmem:[%s926_s2] ss:$0 sm:$0xff]  ;;  %s190_s27 = sadd.s32 %s620_s24, %s619_s23 }
  0x12   : > { %s196_s20 = scalar_lea.vmem %s183_s19, %s704_s8  ;;  %s621_s28 = sshll.u32 %s190_s27, 2 }
  0x13   : > { %361 = vmatpush.bf16.msrb.mxu0 %v711_v4  ;;  %392 = vmatpush.bf16.msrb.mxu1 %v712_v7  ;;  %v705_v8 = vld [vmem:[%s196_s20] sm:$0xff]  ;;  %v199_v9 = vld [vmem:[%s196_s20 + $0x8] sm:$0x3]  ;;  %v709_v10 = vld [vmem:[%s196_s20 + $0x18] sm:$0xff]  ;;  %s192_s12 = scalar_lea.vmem %s927_s3, %s621_s28 }
  0x14   : > { %432 = vmatpush.bf16.msrb.mxu2 %v714_v5  ;;  %466 = vmatpush.bf16.msrb.mxu3 %v715_v6  ;;  %v210_v11 = vunpack.c.l.b16 %v199_v9  ;;  %v676_v12 = vld [vmem:[%s196_s20 + $0x38] sm:$0x3]  ;;  %v648_v13 = vld [vmem:[%s196_s20 + $0x20] sm:$0x3]  ;;  %v214_v15 = vrot.slane %v705_v8, 1  ;;  %v268_v16 = vrot.slane %v705_v8, 2 }
  0x15   : > { %638 = vmatmul.msk.bf16.vlgmr.msra.gmra.mxu1 %vm223_vm0, %v705_v8  ;;  %659 = vmatmul.msk.bf16.vlgmr.msra.gmra.mxu3 %vm223_vm0, %v709_v10  ;;  %v445_v17 = vunpack.c.l.b16 %v676_v12  ;;  %v340_v20 = vunpack.c.l.b16 %v648_v13  ;;  %v713_v24 = vld [vmem:[%s196_s20 + $0x30] sm:$0xff]  ;;  %v373_v29 = vrot.slane %v709_v10, 2  ;;  %v342_v33 = vrot.slane %v709_v10, 1 }
  0x16   : > { %v212_v14 = vpack.c.b16 %v210_v11, %v210_v11  ;;  %v447_v27 = vrot.slane %v713_v24, 1  ;;  %v478_v36 = vrot.slane %v713_v24, 2 }
  0x17   : > { %v446_v25 = vpack.c.b16 %v445_v17, %v445_v17  ;;  %v341_v26 = vpack.c.b16 %v340_v20, %v340_v20 }
  0x18   : > { %v215_v18 = vrot.slane %v212_v14, 1  ;;  %v269_v19 = vrot.slane %v212_v14, 2 }
  0x19   : > { %v448_v28 = vrot.slane %v446_v25, 1  ;;  %v374_v30 = vrot.slane %v341_v26, 2  ;;  %v343_v34 = vrot.slane %v341_v26, 1  ;;  %v479_v37 = vrot.slane %v446_v25, 2 }
  0x1a   : > { %v216_v22 = vsel %vm213_vm1, %v214_v15, %v215_v18  ;;  %v270_v23 = vsel %vm267_vm2, %v268_v16, %v269_v19 }
  0x1b   : > { %633 = vmatmul.msk.bf16.vlgmr.msra.gmra.mxu0 %vm223_vm0, %v216_v22  ;;  %645 = vmatmul.msk.bf16.vlgmr.msra.gmra.mxu2 %vm223_vm0, %v270_v23  ;;  %v449_v31 = vsel %vm213_vm1, %v447_v27, %v448_v28  ;;  %v375_v32 = vsel %vm267_vm2, %v373_v29, %v374_v30  ;;  %v344_v35 = vsel %vm213_vm1, %v342_v33, %v343_v34 }
  0x1c   : > { %497 = vmatpush.bf16.msra.mxu0 %v716_v21  ;;  %v480_v38 = vsel %vm267_vm2, %v478_v36, %v479_v37 }
  0x25   : > { %694 = vmatmul.msk.bf16.vlgmr.msrb.gmra.mxu3 %vm223_vm0, %v449_v31  ;;  %673 = vmatmul.msk.bf16.vlgmr.msrb.gmra.mxu1 %vm223_vm0, %v375_v32 }
  0x2b   : > { %666 = vmatmul.msk.bf16.vlgmr.msrb.gmra.mxu0 %vm223_vm0, %v344_v35  ;;  %687 = vmatmul.msk.bf16.vlgmr.msrb.gmra.mxu2 %vm223_vm0, %v713_v24 }
  0x3b   : > { %701 = vmatmul.msk.bf16.vlgmr.msra.gmra.mxu0 %vm223_vm0, %v480_v38 }
  0x92   : > { %v259_v40 = vpop.f32.mrf.mxu1 }
  0x98   : > { %v236_v39 = vpop.f32.mrf.mxu0  ;;  %v329_v42 = vpop.f32.mrf.mxu3 }
  0x99   : > { %v260_v45 = vadd.f32 %v259_v40, %v236_v39 }
  0x9a   : > { %v261_v44 = vpop.f32.mrf.mxu1 }
  0x9e   : > { %v289_v41 = vpop.f32.mrf.mxu2 }
  0x9f   : > { %v294_v47 = vadd.f32 %v289_v41, %v260_v45 }
  0xa0   : > { %v238_v43 = vpop.f32.mrf.mxu0  ;;  %v331_v49 = vpop.f32.mrf.mxu3 }
  0xa1   : > { %v334_v50 = vadd.f32 %v329_v42, %v294_v47  ;;  %v262_v52 = vadd.f32 %v261_v44, %v238_v43 }
  0xa2   : > { %v394_v51 = vpop.f32.mrf.mxu1 }
  0xa6   : > { %v291_v46 = vpop.f32.mrf.mxu2 }
  0xa7   : > { %v295_v55 = vadd.f32 %v291_v46, %v262_v52 }
  0xa8   : > { %v363_v48 = vpop.f32.mrf.mxu0  ;;  %v468_v60 = vpop.f32.mrf.mxu3 }
  0xa9   : > { %v368_v53 = vadd.f32 %v363_v48, %v334_v50  ;;  %v335_v58 = vadd.f32 %v331_v49, %v295_v55 }
  0xaa   : > { %v396_v62 = vpop.f32.mrf.mxu1 }
  0xab   : > { %v399_v57 = vadd.f32 %v394_v51, %v368_v53 }
  0xae   : > { %v434_v54 = vpop.f32.mrf.mxu2 }
  0xaf   : > { %v439_v59 = vadd.f32 %v434_v54, %v399_v57 }
  0xb0   : > { %v365_v56 = vpop.f32.mrf.mxu0  ;;  %v470_v8 = vpop.f32.mrf.mxu3 }
  0xb1   : > { %v369_v61 = vadd.f32 %v365_v56, %v335_v58  ;;  %v473_v63 = vadd.f32 %v468_v60, %v439_v59 }
  0xb3   : > { %v400_v3 = vadd.f32 %v396_v62, %v369_v61 }
  0xb6   : > { %v436_v1 = vpop.f32.mrf.mxu2 }
  0xb7   : > { %v440_v5 = vadd.f32 %v436_v1, %v400_v3 }
  0xb8   : > { %v499_v2 = vpop.f32.mrf.mxu0 }
  0xb9   : > { %v504_v4 = vadd.f32 %v499_v2, %v473_v63  ;;  %v474_v9 = vadd.f32 %v470_v8, %v440_v5 }
  0xbb   : > { %v510_v6 = vadd.f32 %v758_v0, %v504_v4 }
  0xbd   : > { %v512_v7 = vmax.f32 %v510_v6, 0.0 }
  0xbf   : > { %v514_v10 = vpack.c.bf16 %v512_v7, %v512_v7 }
  0xc0   : > { %v501_v11 = vpop.f32.mrf.mxu0 }
  0xc1   : > { %517 = vst.msk [vmem:[%s192_s12] sm:$0xf] %vm516_vm3, %v514_v10  ;;  %v505_v12 = vadd.f32 %v501_v11, %v474_v9 }
  0xc3   : > { %v511_v13 = vadd.f32 %v758_v0, %v505_v12 }
  0xc5   : > { %v513_v14 = vmax.f32 %v511_v13, 0.0 }
  0xc7   : > { %v515_v15 = vpack.c.bf16 %v513_v14, %v513_v14 }
  0xc9   : > { %518 = vst.msk [vmem:[%s192_s12 + $0x4] sm:$0xf] %vm516_vm3, %v515_v15 }
  0xca PF: > { %s13_s16 = sadd.s32 1, %s797_s16   ;;  %s928_s12 = smov %s789_s14 }
  0xcb   : > { %p10_p7 = scmp.ge.s32.totalorder %s13_s16, 34   ;;  %s929_s13 = smov %s793_s15 }
  0xcc   : > { %s930_s14 = smov %s933_s17  ;;  %s931_s15 = smov %s937_s18 }
  0xcd   :  { %12 = sbr.rel (!%p10_p7) target bundleno = 3 (0x3), region = 73 }

// kernel: bottleneck_forward.7
= control target key start
LH: loop header
LB: loop body
LE: loop exit
PB: predicated region body
PF: predicated region fallthrough
CT: control target
= control target key end

     0   :  { %s1130_s15 = smov 0   ;;  %s1132_s16 = smov 0   ;;  %s1311_s0 = inlined_call_operand.vmem [shape: bf16[512,16], index: 0, kind: input, shape index: {}]   ;;  %s1312_s1 = inlined_call_operand.vmem [shape: bf16[16,64], index: 1, kind: input, shape index: {}]   ;;  %s1313_s2 = inlined_call_operand.vmem [shape: f32[1,64], index: 2, kind: input, shape index: {}]   ;;  %s1314_s3 = inlined_call_operand.vmem [shape: bf16[512,64], index: 3, kind: input, shape index: {}]   ;;  %s1315_s4 = inlined_call_operand.vmem [shape: bf16[512,64], index: 4, kind: output, shape index: {}]  }
   0x1   :  { %s1134_s17 = smov 0  }
   0x2 LB: > { %s26_s18 = sadd.s32 1, %s1099_s16  ;;  %p864_p0 = scmp.ge.s32.totalorder %s1103_s17, 1  ;;  %s1103_s17 = sphi %s1134_s17, %s14_s17   ;;  %s1099_s16 = sphi %s1132_s16, %s1317_s16   ;;  %s1095_s15 = sphi %s1130_s15, %s1316_s15  }
   0x3   : > { %p28_p1 = scmp.ge.s32.totalorder %s26_s18, 2  ;;  %p210_p2 = scmp.lt.s32.totalorder %s1103_s17, 3 }
   0x5   : > { %s1319_s18 = smov (%p28_p1, %s26_s18), 0  ;;  %p211_p3 = pnand %p864_p0, %p210_p2 }
   0x6   : > { %s865_s21 = sshll.u32 (!%p211_p3), %s1095_s15, 5 }
   0x7   : > { %214 = sbr.rel (%p211_p3) target bundleno = 216 (0xd8), region = 36  ;;  %p255_p4 = scmp.lt.s32.totalorder (!%p211_p3), %s865_s21, 63 }
   0xc   : > { %v973_v0 = vld [vmem:[%s1312_s1] sm:$0xff]  ;;  %s1321_s21 = smov (!%p255_p4, %s865_s21), 63  ;;  %vm410_vm0 = vcmask 130048   ;;  %vm708_vm1 = vcmask 519168  }
   0xd   : > { %466 = vmatpush.bf16.msra.mxu0 %v973_v0  ;;  %1053 = vmatpush.bf16.msra.mxu1 %v973_v0  ;;  %s1151_s22 = sshll.u32 %s1321_s21, 2  ;;  %v1184_v19 = vld [vmem:[%s1313_s2] ss:$0 sm:$0xff] }
   0xe   : > { %1054 = vmatpush.bf16.msra.mxu2 %v973_v0  ;;  %1055 = vmatpush.bf16.msra.mxu3 %v973_v0  ;;  %s258_s25 = scalar_lea.vmem %s1311_s0, %s1151_s22  ;;  %s1177_s28 = scalar_lea.vmem %s1314_s3, %s1151_s22 }
   0xf   : > { %v957_v1 = vld [vmem:[%s258_s25] sm:$0xff]  ;;  %v958_v5 = vld [vmem:[%s258_s25 + $0x8] sm:$0xff]  ;;  %v959_v9 = vld [vmem:[%s258_s25 + $0x10] sm:$0xff]  ;;  %s1194_s7 = scalar_lea.vmem %s1315_s4, %s1151_s22 }
  0x10   : > { %v961_v2 = vld [vmem:[%s258_s25 + $0x20] sm:$0xff]  ;;  %939 = vmatmul.msk.bf16.vlgmr.msra.gmra.mxu0 %vm410_vm0, %v957_v1  ;;  %v962_v6 = vld [vmem:[%s258_s25 + $0x28] sm:$0xff]  ;;  %v963_v10 = vld [vmem:[%s258_s25 + $0x30] sm:$0xff] }
  0x11   : > { %v965_v3 = vld [vmem:[%s258_s25 + $0x40] sm:$0xff]  ;;  %943 = vmatmul.msk.bf16.vlgmr.msra.gmra.mxu1 %vm410_vm0, %v961_v2  ;;  %v966_v7 = vld [vmem:[%s258_s25 + $0x48] sm:$0xff]  ;;  %v967_v11 = vld [vmem:[%s258_s25 + $0x50] sm:$0xff] }
  0x12   : > { %v969_v4 = vld [vmem:[%s258_s25 + $0x60] sm:$0xff]  ;;  %947 = vmatmul.msk.bf16.vlgmr.msra.gmra.mxu2 %vm410_vm0, %v965_v3  ;;  %v970_v8 = vld [vmem:[%s258_s25 + $0x68] sm:$0xff]  ;;  %v971_v12 = vld [vmem:[%s258_s25 + $0x70] sm:$0xff] }
  0x13   : > { %951 = vmatmul.msk.bf16.vlgmr.msra.gmra.mxu3 %vm410_vm0, %v969_v4  ;;  %v960_v13 = vld [vmem:[%s258_s25 + $0x18] sm:$0xff]  ;;  %v975_v17 = vld [vmem:[%s1177_s28] sm:$0xff]   ;;  %v1038_v52 = vld [vmem:[%s1177_s28 + $0x8] sm:$0xff]  }
  0x14   : > { %v964_v14 = vld [vmem:[%s258_s25 + $0x38] sm:$0xff]  ;;  %v1041_v18 = vld [vmem:[%s1177_s28 + $0x20] sm:$0xff]   ;;  %v976_v20 = vunpack.c.l.bf16 %v975_v17  ;;  %v977_v38 = vunpack.c.h.bf16 %v975_v17  ;;  %v1042_v53 = vld [vmem:[%s1177_s28 + $0x28] sm:$0xff]   ;;  %v980_v0 = vunpack.c.l.bf16 %v1038_v52 }
  0x15   : > { %v968_v15 = vld [vmem:[%s258_s25 + $0x58] sm:$0xff]  ;;  %v992_v21 = vunpack.c.l.bf16 %v1041_v18  ;;  %v1045_v28 = vld [vmem:[%s1177_s28 + $0x40] sm:$0xff]   ;;  %v993_v39 = vunpack.c.h.bf16 %v1041_v18  ;;  %v996_v1 = vunpack.c.l.bf16 %v1042_v53 }
  0x16   : > { %v972_v16 = vld [vmem:[%s258_s25 + $0x78] sm:$0xff]  ;;  %v1049_v29 = vld [vmem:[%s1177_s28 + $0x60] sm:$0xff]   ;;  %v1008_v32 = vunpack.c.l.bf16 %v1045_v28  ;;  %v1009_v58 = vunpack.c.h.bf16 %v1045_v28  ;;  %v997_v28 = vunpack.c.h.bf16 %v1042_v53 }
  0x17   : > { %v1024_v33 = vunpack.c.l.bf16 %v1049_v29  ;;  %v1025_v59 = vunpack.c.h.bf16 %v1049_v29 }
  0x20   : > { %940 = vmatmul.msk.bf16.gmra.mxu0 %vm410_vm0, %v958_v5 }
  0x21   : > { %944 = vmatmul.msk.bf16.gmra.mxu1 %vm410_vm0, %v962_v6 }
  0x22   : > { %948 = vmatmul.msk.bf16.gmra.mxu2 %vm410_vm0, %v966_v7 }
  0x23   : > { %952 = vmatmul.msk.bf16.gmra.mxu3 %vm410_vm0, %v970_v8 }
  0x30   : > { %941 = vmatmul.msk.bf16.gmra.mxu0 %vm410_vm0, %v959_v9 }
  0x31   : > { %945 = vmatmul.msk.bf16.gmra.mxu1 %vm410_vm0, %v963_v10 }
  0x32   : > { %949 = vmatmul.msk.bf16.gmra.mxu2 %vm410_vm0, %v967_v11 }
  0x33   : > { %953 = vmatmul.msk.bf16.gmra.mxu3 %vm410_vm0, %v971_v12  ;;  %v1046_v12 = vld [vmem:[%s1177_s28 + $0x48] sm:$0xff]  }
  0x40   : > { %942 = vmatmul.msk.bf16.gmra.mxu0 %vm410_vm0, %v960_v13  ;;  %v1050_v13 = vld [vmem:[%s1177_s28 + $0x68] sm:$0xff]  }
  0x41   : > { %946 = vmatmul.msk.bf16.gmra.mxu1 %vm410_vm0, %v964_v14 }
  0x42   : > { %950 = vmatmul.msk.bf16.gmra.mxu2 %vm410_vm0, %v968_v15 }
  0x43   : > { %954 = vmatmul.msk.bf16.gmra.mxu3 %vm410_vm0, %v972_v16 }
  0x8d   : > { %v468_v22 = vpop.f32.mrf.mxu0 }
  0x8e   : > { %v488_v23 = vpop.f32.mrf.mxu1  ;;  %v469_v24 = vadd.f32 %v1184_v19, %v468_v22  ;;  %v1028_v22 = vunpack.c.l.bf16 %v1050_v13 }
  0x8f   : > { %v489_v25 = vadd.f32 %v1184_v19, %v488_v23 }
  0x90   : > { %v612_v26 = vadd.f32 %v976_v20, %v469_v24 }
  0x91   : > { %v620_v27 = vadd.f32 %v992_v21, %v489_v25  ;;  %v1012_v21 = vunpack.c.l.bf16 %v1046_v12 }
  0x92   : > { %v644_v30 = vmax.f32 %v612_v26, 0.0 }
  0x93   : > { %v652_v31 = vmax.f32 %v620_v27, 0.0  ;;  %v981_v27 = vunpack.c.h.bf16 %v1038_v52 }
  0x94   : > { %v676_v34 = vpack.c.bf16 %v644_v30, %v644_v30 }
  0x95   : > { %v684_v35 = vpack.c.bf16 %v652_v31, %v652_v31  ;;  %v508_v36 = vpop.f32.mrf.mxu2  ;;  %v470_v42 = vpop.f32.mrf.mxu0 }
  0x96   : > { %v528_v37 = vpop.f32.mrf.mxu3  ;;  %v509_v40 = vadd.f32 %v1184_v19, %v508_v36  ;;  %v490_v43 = vpop.f32.mrf.mxu1  ;;  %709 = vst.msk [vmem:[%s1194_s7] sm:$0xf] %vm708_vm1, %v676_v34  ;;  %v471_v44 = vadd.f32 %v1184_v19, %v470_v42  ;;  %v1043_v42 = vld [vmem:[%s1177_s28 + $0x30] sm:$0xff]  }
  0x97   : > { %v529_v41 = vadd.f32 %v1184_v19, %v528_v37  ;;  %v491_v45 = vadd.f32 %v1184_v19, %v490_v43  ;;  %717 = vst.msk [vmem:[%s1194_s7 + $0x20] sm:$0xf] %vm708_vm1, %v684_v35 }
  0x98   : > { %v628_v46 = vadd.f32 %v1008_v32, %v509_v40  ;;  %v613_v48 = vadd.f32 %v977_v38, %v471_v44 }
  0x99   : > { %v636_v47 = vadd.f32 %v1024_v33, %v529_v41  ;;  %v621_v49 = vadd.f32 %v993_v39, %v491_v45  ;;  %v1039_v41 = vld [vmem:[%s1177_s28 + $0x10] sm:$0xff]  }
  0x9a   : > { %v660_v50 = vmax.f32 %v628_v46, 0.0  ;;  %v645_v54 = vmax.f32 %v613_v48, 0.0  ;;  %v1029_v48 = vunpack.c.h.bf16 %v1050_v13  ;;  %v984_v53 = vunpack.c.l.bf16 %v1039_v41 }
  0x9b   : > { %v668_v51 = vmax.f32 %v636_v47, 0.0  ;;  %v653_v55 = vmax.f32 %v621_v49, 0.0  ;;  %v1013_v47 = vunpack.c.h.bf16 %v1046_v12 }
  0x9c   : > { %v692_v56 = vpack.c.bf16 %v660_v50, %v660_v50  ;;  %v677_v60 = vpack.c.bf16 %v645_v54, %v645_v54  ;;  %v1000_v54 = vunpack.c.l.bf16 %v1043_v42 }
  0x9d   : > { %v700_v57 = vpack.c.bf16 %v668_v51, %v668_v51  ;;  %v685_v61 = vpack.c.bf16 %v653_v55, %v653_v55  ;;  %v510_v62 = vpop.f32.mrf.mxu2  ;;  %v473_v4 = vpop.f32.mrf.mxu0 }
  0x9e   : > { %v530_v63 = vpop.f32.mrf.mxu3  ;;  %725 = vst.msk [vmem:[%s1194_s7 + $0x40] sm:$0xf] %vm708_vm1, %v692_v56  ;;  %v511_v2 = vadd.f32 %v1184_v19, %v510_v62  ;;  %v493_v5 = vpop.f32.mrf.mxu1  ;;  %v474_v6 = vadd.f32 %v1184_v19, %v473_v4 }
  0x9f   : > { %v531_v3 = vadd.f32 %v1184_v19, %v530_v63  ;;  %733 = vst.msk [vmem:[%s1194_s7 + $0x60] sm:$0xf] %vm708_vm1, %v700_v57  ;;  %v494_v7 = vadd.f32 %v1184_v19, %v493_v5 }
  0xa0   : > { %710 = vst.msk [vmem:[%s1194_s7 + $0x4] sm:$0xf] %vm708_vm1, %v677_v60  ;;  %v629_v8 = vadd.f32 %v1009_v58, %v511_v2  ;;  %v614_v10 = vadd.f32 %v980_v0, %v474_v6  ;;  %v1051_v2 = vld [vmem:[%s1177_s28 + $0x70] sm:$0xff]  }
  0xa1   : > { %v637_v9 = vadd.f32 %v1025_v59, %v531_v3  ;;  %718 = vst.msk [vmem:[%s1194_s7 + $0x24] sm:$0xf] %vm708_vm1, %v685_v61  ;;  %v622_v11 = vadd.f32 %v996_v1, %v494_v7  ;;  %v1047_v1 = vld [vmem:[%s1177_s28 + $0x50] sm:$0xff]  }
  0xa2   : > { %v661_v14 = vmax.f32 %v629_v8, 0.0  ;;  %v646_v16 = vmax.f32 %v614_v10, 0.0  ;;  %v1032_v10 = vunpack.c.l.bf16 %v1051_v2 }
  0xa3   : > { %v669_v15 = vmax.f32 %v637_v9, 0.0  ;;  %v654_v17 = vmax.f32 %v622_v11, 0.0  ;;  %v1016_v9 = vunpack.c.l.bf16 %v1047_v1 }
  0xa4   : > { %v693_v18 = vpack.c.bf16 %v661_v14, %v661_v14  ;;  %v678_v23 = vpack.c.bf16 %v646_v16, %v646_v16  ;;  %v1001_v16 = vunpack.c.h.bf16 %v1043_v42 }
  0xa5   : > { %v701_v20 = vpack.c.bf16 %v669_v15, %v669_v15  ;;  %v686_v24 = vpack.c.bf16 %v654_v17, %v654_v17  ;;  %v513_v25 = vpop.f32.mrf.mxu2  ;;  %v475_v31 = vpop.f32.mrf.mxu0  ;;  %v985_v15 = vunpack.c.h.bf16 %v1039_v41 }
  0xa6   : > { %v533_v26 = vpop.f32.mrf.mxu3  ;;  %726 = vst.msk [vmem:[%s1194_s7 + $0x44] sm:$0xf] %vm708_vm1, %v693_v18  ;;  %v514_v29 = vadd.f32 %v1184_v19, %v513_v25  ;;  %v495_v32 = vpop.f32.mrf.mxu1  ;;  %v476_v33 = vadd.f32 %v1184_v19, %v475_v31  ;;  %v1044_v31 = vld [vmem:[%s1177_s28 + $0x38] sm:$0xff]  }
  0xa7   : > { %v534_v30 = vadd.f32 %v1184_v19, %v533_v26  ;;  %734 = vst.msk [vmem:[%s1194_s7 + $0x64] sm:$0xf] %vm708_vm1, %v701_v20  ;;  %v496_v34 = vadd.f32 %v1184_v19, %v495_v32 }
  0xa8   : > { %711 = vst.msk [vmem:[%s1194_s7 + $0x8] sm:$0xf] %vm708_vm1, %v678_v23  ;;  %v630_v35 = vadd.f32 %v1012_v21, %v514_v29  ;;  %v615_v37 = vadd.f32 %v981_v27, %v476_v33 }
  0xa9   : > { %v638_v36 = vadd.f32 %v1028_v22, %v534_v30  ;;  %719 = vst.msk [vmem:[%s1194_s7 + $0x28] sm:$0xf] %vm708_vm1, %v686_v24  ;;  %v623_v38 = vadd.f32 %v997_v28, %v496_v34  ;;  %v1040_v30 = vld [vmem:[%s1177_s28 + $0x18] sm:$0xff]  }
  0xaa   : > { %v662_v39 = vmax.f32 %v630_v35, 0.0  ;;  %v647_v43 = vmax.f32 %v615_v37, 0.0  ;;  %v1033_v37 = vunpack.c.h.bf16 %v1051_v2  ;;  %v988_v42 = vunpack.c.l.bf16 %v1040_v30 }
  0xab   : > { %v670_v40 = vmax.f32 %v638_v36, 0.0  ;;  %v655_v44 = vmax.f32 %v623_v38, 0.0  ;;  %v1017_v36 = vunpack.c.h.bf16 %v1047_v1 }
  0xac   : > { %v694_v45 = vpack.c.bf16 %v662_v39, %v662_v39  ;;  %v679_v49 = vpack.c.bf16 %v647_v43, %v647_v43  ;;  %v1004_v43 = vunpack.c.l.bf16 %v1044_v31 }
  0xad   : > { %v702_v46 = vpack.c.bf16 %v670_v40, %v670_v40  ;;  %v687_v50 = vpack.c.bf16 %v655_v44, %v655_v44  ;;  %v515_v51 = vpop.f32.mrf.mxu2  ;;  %v478_v57 = vpop.f32.mrf.mxu0 }
  0xae   : > { %v535_v52 = vpop.f32.mrf.mxu3  ;;  %727 = vst.msk [vmem:[%s1194_s7 + $0x48] sm:$0xf] %vm708_vm1, %v694_v45  ;;  %v516_v55 = vadd.f32 %v1184_v19, %v515_v51  ;;  %v498_v58 = vpop.f32.mrf.mxu1  ;;  %v479_v59 = vadd.f32 %v1184_v19, %v478_v57 }
  0xaf   : > { %v536_v56 = vadd.f32 %v1184_v19, %v535_v52  ;;  %735 = vst.msk [vmem:[%s1194_s7 + $0x68] sm:$0xf] %vm708_vm1, %v702_v46  ;;  %v499_v60 = vadd.f32 %v1184_v19, %v498_v58 }
  0xb0   : > { %712 = vst.msk [vmem:[%s1194_s7 + $0xc] sm:$0xf] %vm708_vm1, %v679_v49  ;;  %v631_v61 = vadd.f32 %v1013_v47, %v516_v55  ;;  %v616_v63 = vadd.f32 %v984_v53, %v479_v59  ;;  %v1052_v55 = vld [vmem:[%s1177_s28 + $0x78] sm:$0xff]  }
  0xb1   : > { %v639_v62 = vadd.f32 %v1029_v48, %v536_v56  ;;  %720 = vst.msk [vmem:[%s1194_s7 + $0x2c] sm:$0xf] %vm708_vm1, %v687_v50  ;;  %v624_v0 = vadd.f32 %v1000_v54, %v499_v60  ;;  %v1048_v54 = vld [vmem:[%s1177_s28 + $0x58] sm:$0xff]  }
  0xb2   : > { %v663_v3 = vmax.f32 %v631_v61, 0.0  ;;  %v648_v5 = vmax.f32 %v616_v63, 0.0  ;;  %v1036_v63 = vunpack.c.l.bf16 %v1052_v55 }
  0xb3   : > { %v671_v4 = vmax.f32 %v639_v62, 0.0  ;;  %v656_v6 = vmax.f32 %v624_v0, 0.0  ;;  %v1020_v62 = vunpack.c.l.bf16 %v1048_v54 }
  0xb4   : > { %v695_v7 = vpack.c.bf16 %v663_v3, %v663_v3  ;;  %v680_v11 = vpack.c.bf16 %v648_v5, %v648_v5  ;;  %v1005_v5 = vunpack.c.h.bf16 %v1044_v31 }
  0xb5   : > { %v703_v8 = vpack.c.bf16 %v671_v4, %v671_v4  ;;  %v688_v12 = vpack.c.bf16 %v656_v6, %v656_v6  ;;  %v518_v13 = vpop.f32.mrf.mxu2  ;;  %v480_v20 = vpop.f32.mrf.mxu0  ;;  %v989_v4 = vunpack.c.h.bf16 %v1040_v30 }
  0xb6   : > { %v538_v14 = vpop.f32.mrf.mxu3  ;;  %728 = vst.msk [vmem:[%s1194_s7 + $0x4c] sm:$0xf] %vm708_vm1, %v695_v7  ;;  %v519_v17 = vadd.f32 %v1184_v19, %v518_v13  ;;  %v500_v21 = vpop.f32.mrf.mxu1  ;;  %v481_v22 = vadd.f32 %v1184_v19, %v480_v20 }
  0xb7   : > { %v539_v18 = vadd.f32 %v1184_v19, %v538_v14  ;;  %736 = vst.msk [vmem:[%s1194_s7 + $0x6c] sm:$0xf] %vm708_vm1, %v703_v8  ;;  %v501_v23 = vadd.f32 %v1184_v19, %v500_v21 }
  0xb8   : > { %713 = vst.msk [vmem:[%s1194_s7 + $0x10] sm:$0xf] %vm708_vm1, %v680_v11  ;;  %v632_v24 = vadd.f32 %v1016_v9, %v519_v17  ;;  %v617_v26 = vadd.f32 %v985_v15, %v481_v22 }
  0xb9   : > { %v640_v25 = vadd.f32 %v1032_v10, %v539_v18  ;;  %721 = vst.msk [vmem:[%s1194_s7 + $0x30] sm:$0xf] %vm708_vm1, %v688_v12  ;;  %v625_v27 = vadd.f32 %v1001_v16, %v501_v23  ;;  %v1021_v23 = vunpack.c.h.bf16 %v1048_v54 }
  0xba   : > { %v664_v28 = vmax.f32 %v632_v24, 0.0  ;;  %v649_v32 = vmax.f32 %v617_v26, 0.0  ;;  %v1037_v24 = vunpack.c.h.bf16 %v1052_v55 }
  0xbb   : > { %v672_v29 = vmax.f32 %v640_v25, 0.0  ;;  %v657_v33 = vmax.f32 %v625_v27, 0.0 }
  0xbc   : > { %v696_v34 = vpack.c.bf16 %v664_v28, %v664_v28  ;;  %v681_v38 = vpack.c.bf16 %v649_v32, %v649_v32 }
  0xbd   : > { %v704_v35 = vpack.c.bf16 %v672_v29, %v672_v29  ;;  %v689_v39 = vpack.c.bf16 %v657_v33, %v657_v33  ;;  %v520_v40 = vpop.f32.mrf.mxu2  ;;  %v483_v46 = vpop.f32.mrf.mxu0 }
  0xbe   : > { %v540_v41 = vpop.f32.mrf.mxu3  ;;  %729 = vst.msk [vmem:[%s1194_s7 + $0x50] sm:$0xf] %vm708_vm1, %v696_v34  ;;  %v521_v44 = vadd.f32 %v1184_v19, %v520_v40  ;;  %v503_v47 = vpop.f32.mrf.mxu1  ;;  %v484_v48 = vadd.f32 %v1184_v19, %v483_v46 }
  0xbf   : > { %v541_v45 = vadd.f32 %v1184_v19, %v540_v41  ;;  %737 = vst.msk [vmem:[%s1194_s7 + $0x70] sm:$0xf] %vm708_vm1, %v704_v35  ;;  %v504_v49 = vadd.f32 %v1184_v19, %v503_v47 }
  0xc0   : > { %714 = vst.msk [vmem:[%s1194_s7 + $0x14] sm:$0xf] %vm708_vm1, %v681_v38  ;;  %v633_v50 = vadd.f32 %v1017_v36, %v521_v44  ;;  %v618_v52 = vadd.f32 %v988_v42, %v484_v48 }
  0xc1   : > { %v641_v51 = vadd.f32 %v1033_v37, %v541_v45  ;;  %722 = vst.msk [vmem:[%s1194_s7 + $0x34] sm:$0xf] %vm708_vm1, %v689_v39  ;;  %v626_v53 = vadd.f32 %v1004_v43, %v504_v49 }
  0xc2   : > { %v665_v56 = vmax.f32 %v633_v50, 0.0  ;;  %v650_v58 = vmax.f32 %v618_v52, 0.0 }
  0xc3   : > { %v673_v57 = vmax.f32 %v641_v51, 0.0  ;;  %v658_v59 = vmax.f32 %v626_v53, 0.0 }
  0xc4   : > { %v697_v60 = vpack.c.bf16 %v665_v56, %v665_v56  ;;  %v682_v0 = vpack.c.bf16 %v650_v58, %v650_v58 }
  0xc5   : > { %v705_v61 = vpack.c.bf16 %v673_v57, %v673_v57  ;;  %v690_v1 = vpack.c.bf16 %v658_v59, %v658_v59  ;;  %v523_v2 = vpop.f32.mrf.mxu2  ;;  %v485_v8 = vpop.f32.mrf.mxu0 }
  0xc6   : > { %v543_v3 = vpop.f32.mrf.mxu3  ;;  %730 = vst.msk [vmem:[%s1194_s7 + $0x54] sm:$0xf] %vm708_vm1, %v697_v60  ;;  %v524_v6 = vadd.f32 %v1184_v19, %v523_v2  ;;  %v505_v9 = vpop.f32.mrf.mxu1  ;;  %v486_v10 = vadd.f32 %v1184_v19, %v485_v8 }
  0xc7   : > { %v544_v7 = vadd.f32 %v1184_v19, %v543_v3  ;;  %738 = vst.msk [vmem:[%s1194_s7 + $0x74] sm:$0xf] %vm708_vm1, %v705_v61  ;;  %v506_v11 = vadd.f32 %v1184_v19, %v505_v9 }
  0xc8   : > { %715 = vst.msk [vmem:[%s1194_s7 + $0x18] sm:$0xf] %vm708_vm1, %v682_v0  ;;  %v634_v12 = vadd.f32 %v1020_v62, %v524_v6  ;;  %v619_v14 = vadd.f32 %v989_v4, %v486_v10 }
  0xc9   : > { %v642_v13 = vadd.f32 %v1036_v63, %v544_v7  ;;  %723 = vst.msk [vmem:[%s1194_s7 + $0x38] sm:$0xf] %vm708_vm1, %v690_v1  ;;  %v627_v15 = vadd.f32 %v1005_v5, %v506_v11 }
  0xca   : > { %v666_v16 = vmax.f32 %v634_v12, 0.0  ;;  %v651_v18 = vmax.f32 %v619_v14, 0.0 }
  0xcb   : > { %v674_v17 = vmax.f32 %v642_v13, 0.0  ;;  %v659_v20 = vmax.f32 %v627_v15, 0.0 }
  0xcc   : > { %v698_v21 = vpack.c.bf16 %v666_v16, %v666_v16  ;;  %v683_v25 = vpack.c.bf16 %v651_v18, %v651_v18 }
  0xcd   : > { %v706_v22 = vpack.c.bf16 %v674_v17, %v674_v17  ;;  %v691_v26 = vpack.c.bf16 %v659_v20, %v659_v20  ;;  %v525_v27 = vpop.f32.mrf.mxu2 }
  0xce   : > { %v545_v28 = vpop.f32.mrf.mxu3  ;;  %731 = vst.msk [vmem:[%s1194_s7 + $0x58] sm:$0xf] %vm708_vm1, %v698_v21  ;;  %v526_v29 = vadd.f32 %v1184_v19, %v525_v27 }
  0xcf   : > { %v546_v30 = vadd.f32 %v1184_v19, %v545_v28  ;;  %739 = vst.msk [vmem:[%s1194_s7 + $0x78] sm:$0xf] %vm708_vm1, %v706_v22 }
  0xd0   : > { %716 = vst.msk [vmem:[%s1194_s7 + $0x1c] sm:$0xf] %vm708_vm1, %v683_v25  ;;  %v635_v31 = vadd.f32 %v1021_v23, %v526_v29 }
  0xd1   : > { %v643_v32 = vadd.f32 %v1037_v24, %v546_v30  ;;  %724 = vst.msk [vmem:[%s1194_s7 + $0x3c] sm:$0xf] %vm708_vm1, %v691_v26 }
  0xd2   : > { %v667_v33 = vmax.f32 %v635_v31, 0.0 }
  0xd3   : > { %v675_v34 = vmax.f32 %v643_v32, 0.0 }
  0xd4   : > { %v699_v35 = vpack.c.bf16 %v667_v33, %v667_v33 }
  0xd5   : > { %v707_v36 = vpack.c.bf16 %v675_v34, %v675_v34 }
  0xd6   : > { %732 = vst.msk [vmem:[%s1194_s7 + $0x5c] sm:$0xf] %vm708_vm1, %v699_v35 }
  0xd7   : > { %740 = vst.msk [vmem:[%s1194_s7 + $0x7c] sm:$0xf] %vm708_vm1, %v707_v36 }
  0xd8 PF: > { %s14_s17 = sadd.s32 1, %s1103_s17   ;;  %s1316_s15 = smov %s1099_s16 }
  0xd9   : > { %p11_p5 = scmp.ge.s32.totalorder %s14_s17, 4   ;;  %s1317_s16 = smov %s1319_s18 }
  0xdb   :  { %13 = sbr.rel (!%p11_p5) target bundleno = 2 (0x2), region = 75 }

</bundles_post_ra>
